<compile_context>
chip_gen: v5e
topology: v5e:2x2
jax: 0.10.0
libtpu: 0.0.40
codegen_flags: <defaults>
</compile_context>

<pallas_src>
import jax
import jax.numpy as jnp
from jax import lax
from jax.experimental import pallas as pl
from jax.experimental.pallas import tpu as pltpu


def _make_kernel(H, W, C, C_FEAT, TILE_H):
    """Builds the per-image kernel with static shape parameters baked in."""
    n_chunks = H // TILE_H
    inv_hw = 1.0 / float(H * W)

    def kernel(xp_ref, ws_ref, wh_ref, bh_ref, out_ref):
        # xp_ref : (1, H+2, W+2, C)  bf16  padded NHWC image (one batch elem)
        # ws_ref : (9*C, C_FEAT)     bf16  stem weights, (dh,dw)-major rows
        # wh_ref : (C_FEAT, NCP)     bf16  head weights (transposed, padded)
        # bh_ref : (1, NCP)          f32   head bias (padded)
        # out_ref: (1, 1, NCP)       f32   logits (padded slab)

        def chunk_body(r, pooled_acc):
            h0 = pl.multiple_of(r * TILE_H, TILE_H)
            feat = jnp.zeros((TILE_H * W, C), jnp.float32)  # placeholder type
            feat = jnp.zeros((TILE_H * W, C_FEAT), jnp.float32)
            # 3x3 conv as 9 shifted (rows, C) @ (C, C_FEAT) matmuls.  The
            # padded image already sits in VMEM, so the halo costs nothing.
            # TODO(synk): C is lane-sparse for tiny channel counts; a real
            # backbone would use a channel-padded / W-major layout instead.
            for dh in range(3):
                for dw in range(3):
                    idx = dh * 3 + dw
                    patch = xp_ref[0, pl.ds(h0 + dh, TILE_H), dw:dw + W, :]
                    patch = patch.reshape(TILE_H * W, C)
                    feat = feat + jnp.dot(
                        patch, ws_ref[idx * C:(idx + 1) * C, :],
                        preferred_element_type=jnp.float32)
            feat = jnp.maximum(feat, 0.0)                       # ReLU
            # Global-average-pool contribution of this row chunk.
            return pooled_acc + jnp.sum(feat, axis=0, keepdims=True)

        pooled = lax.fori_loop(0, n_chunks, chunk_body,
                               jnp.zeros((1, C_FEAT), jnp.float32))
        pooled = (pooled * inv_hw).astype(jnp.bfloat16)          # (1, C_FEAT)
        # Replaced head: nn.Linear(in_features, n_class) on the padded slab.
        logits = jnp.dot(pooled, wh_ref[...],
                         preferred_element_type=jnp.float32) + bh_ref[...]
        out_ref[0] = logits

    return kernel


def cassva_forward(x_nchw, w_stem, w_head, b_head, *, tile_h=8):
    """x_nchw: (B, C, H, W) f32.  Returns logits (B, n_class) f32."""
    B, C, H, W = x_nchw.shape
    C_FEAT = w_stem.shape[1]
    n_class = w_head.shape[0]
    assert w_stem.shape == (C * 9, C_FEAT)
    assert w_head.shape == (n_class, C_FEAT)

    # Lane-dense padded class dim (unmasked stores on the output slab).
    NCP = ((n_class + 127) // 128) * 128
    TILE_H = tile_h if H % tile_h == 0 else H

    # ---- layout / dtype glue (done once per call) ----
    # NCHW -> NHWC, pad H/W by 1 (3x3, stride 1, pad 1), cast to bf16.
    x_nhwc = jnp.transpose(x_nchw, (0, 2, 3, 1))
    xp = jnp.pad(x_nhwc, ((0, 0), (1, 1), (1, 1), (0, 0))).astype(jnp.bfloat16)

    ws = w_stem.astype(jnp.bfloat16)                              # (9C, C_FEAT)
    wh = jnp.zeros((C_FEAT, NCP), jnp.bfloat16)
    wh = wh.at[:, :n_class].set(w_head.T.astype(jnp.bfloat16))    # (C_FEAT, NCP)
    bh = jnp.zeros((1, NCP), jnp.float32).at[:, :n_class].set(
        b_head.astype(jnp.float32)[None, :])

    Hp, Wp = H + 2, W + 2
    kernel = _make_kernel(H, W, C, C_FEAT, TILE_H)

    out = pl.pallas_call(
        kernel,
        out_shape=jax.ShapeDtypeStruct((B, 1, NCP), jnp.float32),
        grid_spec=pltpu.PrefetchScalarGridSpec(
            num_scalar_prefetch=0,
            grid=(B,),
            in_specs=[
                pl.BlockSpec((1, Hp, Wp, C), lambda b: (b, 0, 0, 0)),
                pl.BlockSpec((C * 9, C_FEAT), lambda b: (0, 0)),
                pl.BlockSpec((C_FEAT, NCP), lambda b: (0, 0)),
                pl.BlockSpec((1, NCP), lambda b: (0, 0)),
            ],
            out_specs=pl.BlockSpec((1, 1, NCP), lambda b: (b, 0, 0)),
        ),
        compiler_params=pltpu.CompilerParams(
            # Batch axis is embarrassingly parallel -> shard across the two
            # TensorCores on v7x (no-op on single-TC v5e / v6e).
            dimension_semantics=("parallel",),
            # Explicit scoped-VMEM budget; per-step residency is tiny at these
            # shapes and stays well inside v7x's 64 MiB physical VMEM.
            vmem_limit_bytes=32 * 1024 * 1024,
        ),
    )(xp, ws, wh, bh)

    return out.reshape(B, NCP)[:, :n_class]


def _reference(x_nchw, w_stem, w_head, b_head):
    """Pure-JAX reference mirroring the kernel's bf16 quantization."""
    B, C, H, W = x_nchw.shape
    xb = x_nchw.astype(jnp.bfloat16).astype(jnp.float32)
    wsb = w_stem.astype(jnp.bfloat16).astype(jnp.float32)
    whb = w_head.astype(jnp.bfloat16).astype(jnp.float32)
    xp = jnp.pad(xb, ((0, 0), (0, 0), (1, 1), (1, 1)))
    cols = []
    for dh in range(3):
        for dw in range(3):
            cols.append(xp[:, :, dh:dh + H, dw:dw + W])
    xc = (jnp.concatenate(cols, axis=1)
             .transpose(0, 2, 3, 1)
             .reshape(B, H * W, C * 9))
    feat = jnp.maximum(jnp.einsum('bpk,kf->bpf', xc, wsb), 0.0)
    pooled = feat.mean(axis=1).astype(jnp.bfloat16).astype(jnp.float32)
    return pooled @ whb.T + b_head[None, :].astype(jnp.float32)


if __name__ == "__main__":
    # Small, forward-consistent shapes: batch=2, channels=4, spatial=16x16,
    # stem features=128 (lane-friendly), n_class=5.
    B, C, H, W = 2, 4, 16, 16
    C_FEAT, N_CLASS = 128, 5

    key = jax.random.PRNGKey(0)
    k1, k2, k3, k4 = jax.random.split(key, 4)

    w_stem = jax.random.normal(k1, (C * 3 * 3, C_FEAT), jnp.float32) * 0.1
    w_head = jax.random.normal(k2, (N_CLASS, C_FEAT), jnp.float32) * 0.1  # PyTorch (out, in)
    b_head = jax.random.normal(k3, (N_CLASS,), jnp.float32) * 0.01
    x = jax.random.normal(k4, (B, C, H, W), jnp.float32)

    logits = cassva_forward(x, w_stem, w_head, b_head)
    jax.block_until_ready(logits)

    assert logits.shape == (B, N_CLASS), logits.shape
    assert logits.dtype == jnp.float32

    ref = _reference(x, w_stem, w_head, b_head)
    assert jnp.allclose(logits, ref, rtol=5e-2, atol=2e-2), (
        float(jnp.max(jnp.abs(logits - ref))))

    print("KERNEL_OK")
</pallas_src>

<mosaic_0001>
module attributes {stable_mosaic.version = 11 : i64} {
  func.func @kernel(%arg0: i32, %arg1: memref<1x18x18x4xbf16, #tpu.memory_space<vmem>>, %arg2: memref<36x128xbf16, #tpu.memory_space<vmem>>, %arg3: memref<128x128xbf16, #tpu.memory_space<vmem>>, %arg4: memref<1x128xf32, #tpu.memory_space<vmem>>, %arg5: memref<1x1x128xf32, #tpu.memory_space<vmem>>) attributes {dimension_semantics = [#tpu.dimension_semantics<parallel>], iteration_bounds = array<i64: 2>, scalar_prefetch = 0 : i64, scratch_operands = 0 : i64, tpu.core_type = #tpu.core_type<tc>, window_params = [{transform_indices = @transform_0, window_bounds = array<i64: 1, 18, 18, 4>}, {pipeline_mode = #tpu.pipeline_mode<synchronous>, transform_indices = @transform_1, window_bounds = array<i64: 36, 128>}, {pipeline_mode = #tpu.pipeline_mode<synchronous>, transform_indices = @transform_2, window_bounds = array<i64: 128, 128>}, {pipeline_mode = #tpu.pipeline_mode<synchronous>, transform_indices = @transform_3, window_bounds = array<i64: 1, 128>}, {transform_indices = @transform_4, window_bounds = array<i64: 1, 1, 128>}]} {
    %cst = arith.constant 0.000000e+00 : f32
    %0 = vector.broadcast %cst : f32 to vector<1x128xf32>
    %c0_i32 = arith.constant 0 : i32
    %c2_i32 = arith.constant 2 : i32
    %1 = arith.addi %c0_i32, %c2_i32 : i32
    %c1_i32 = arith.constant 1 : i32
    %2 = scf.for %arg6 = %c0_i32 to %1 step %c1_i32 iter_args(%arg7 = %0) -> (vector<1x128xf32>)  : i32 {
      %c8_i32 = arith.constant 8 : i32
      %13 = arith.muli %arg6, %c8_i32 : i32
      %14 = tpu.assume_multiple %13, 8 : i32
      %cst_9 = arith.constant 0.000000e+00 : f32
      %15 = vector.broadcast %cst_9 : f32 to vector<128x128xf32>
      %c0_i32_10 = arith.constant 0 : i32
      %16 = arith.addi %14, %c0_i32_10 : i32
      %c0_11 = arith.constant 0 : index
      %17 = arith.index_cast %16 : i32 to index
      %c0_12 = arith.constant 0 : index
      %c0_13 = arith.constant 0 : index
      %18 = vector.load %arg1[%c0_11, %17, %c0_12, %c0_13] : memref<1x18x18x4xbf16, #tpu.memory_space<vmem>>, vector<1x8x16x4xbf16>
      %19 = vector.shape_cast %18 : vector<1x8x16x4xbf16> to vector<8x16x4xbf16>
      %20 = vector.shape_cast %19 : vector<8x16x4xbf16> to vector<128x4xbf16>
      %c0_14 = arith.constant 0 : index
      %c0_15 = arith.constant 0 : index
      %21 = vector.load %arg2[%c0_14, %c0_15] : memref<36x128xbf16, #tpu.memory_space<vmem>>, vector<4x128xbf16>
      %cst_16 = arith.constant dense<0.000000e+00> : vector<128x128xf32>
      %22 = tpu.matmul %20, %21, %cst_16 {dimension_numbers = #tpu.dot_dimension_numbers<[1], [0], [0], [1], [0, 0, 1, 1], [], []>} : vector<128x4xbf16>, vector<4x128xbf16>, vector<128x128xf32> -> vector<128x128xf32>
      %23 = arith.addf %15, %22 : vector<128x128xf32>
      %c0_i32_17 = arith.constant 0 : i32
      %24 = arith.addi %14, %c0_i32_17 : i32
      %c0_18 = arith.constant 0 : index
      %25 = arith.index_cast %24 : i32 to index
      %c1 = arith.constant 1 : index
      %c0_19 = arith.constant 0 : index
      %26 = vector.load %arg1[%c0_18, %25, %c1, %c0_19] : memref<1x18x18x4xbf16, #tpu.memory_space<vmem>>, vector<1x8x16x4xbf16>
      %27 = vector.shape_cast %26 : vector<1x8x16x4xbf16> to vector<8x16x4xbf16>
      %28 = vector.shape_cast %27 : vector<8x16x4xbf16> to vector<128x4xbf16>
      %c4 = arith.constant 4 : index
      %c0_20 = arith.constant 0 : index
      %29 = vector.load %arg2[%c4, %c0_20] : memref<36x128xbf16, #tpu.memory_space<vmem>>, vector<4x128xbf16>
      %cst_21 = arith.constant dense<0.000000e+00> : vector<128x128xf32>
      %30 = tpu.matmul %28, %29, %cst_21 {dimension_numbers = #tpu.dot_dimension_numbers<[1], [0], [0], [1], [0, 0, 1, 1], [], []>} : vector<128x4xbf16>, vector<4x128xbf16>, vector<128x128xf32> -> vector<128x128xf32>
      %31 = arith.addf %23, %30 : vector<128x128xf32>
      %c0_i32_22 = arith.constant 0 : i32
      %32 = arith.addi %14, %c0_i32_22 : i32
      %c0_23 = arith.constant 0 : index
      %33 = arith.index_cast %32 : i32 to index
      %c2 = arith.constant 2 : index
      %c0_24 = arith.constant 0 : index
      %34 = vector.load %arg1[%c0_23, %33, %c2, %c0_24] : memref<1x18x18x4xbf16, #tpu.memory_space<vmem>>, vector<1x8x16x4xbf16>
      %35 = vector.shape_cast %34 : vector<1x8x16x4xbf16> to vector<8x16x4xbf16>
      %36 = vector.shape_cast %35 : vector<8x16x4xbf16> to vector<128x4xbf16>
      %c8 = arith.constant 8 : index
      %c0_25 = arith.constant 0 : index
      %37 = vector.load %arg2[%c8, %c0_25] : memref<36x128xbf16, #tpu.memory_space<vmem>>, vector<4x128xbf16>
      %cst_26 = arith.constant dense<0.000000e+00> : vector<128x128xf32>
      %38 = tpu.matmul %36, %37, %cst_26 {dimension_numbers = #tpu.dot_dimension_numbers<[1], [0], [0], [1], [0, 0, 1, 1], [], []>} : vector<128x4xbf16>, vector<4x128xbf16>, vector<128x128xf32> -> vector<128x128xf32>
      %39 = arith.addf %31, %38 : vector<128x128xf32>
      %c1_i32_27 = arith.constant 1 : i32
      %40 = arith.addi %14, %c1_i32_27 : i32
      %c0_28 = arith.constant 0 : index
      %41 = arith.index_cast %40 : i32 to index
      %c0_29 = arith.constant 0 : index
      %c0_30 = arith.constant 0 : index
      %42 = vector.load %arg1[%c0_28, %41, %c0_29, %c0_30] : memref<1x18x18x4xbf16, #tpu.memory_space<vmem>>, vector<1x8x16x4xbf16>
      %43 = vector.shape_cast %42 : vector<1x8x16x4xbf16> to vector<8x16x4xbf16>
      %44 = vector.shape_cast %43 : vector<8x16x4xbf16> to vector<128x4xbf16>
      %c12 = arith.constant 12 : index
      %c0_31 = arith.constant 0 : index
      %45 = vector.load %arg2[%c12, %c0_31] : memref<36x128xbf16, #tpu.memory_space<vmem>>, vector<4x128xbf16>
      %cst_32 = arith.constant dense<0.000000e+00> : vector<128x128xf32>
      %46 = tpu.matmul %44, %45, %cst_32 {dimension_numbers = #tpu.dot_dimension_numbers<[1], [0], [0], [1], [0, 0, 1, 1], [], []>} : vector<128x4xbf16>, vector<4x128xbf16>, vector<128x128xf32> -> vector<128x128xf32>
      %47 = arith.addf %39, %46 : vector<128x128xf32>
      %c1_i32_33 = arith.constant 1 : i32
      %48 = arith.addi %14, %c1_i32_33 : i32
      %c0_34 = arith.constant 0 : index
      %49 = arith.index_cast %48 : i32 to index
      %c1_35 = arith.constant 1 : index
      %c0_36 = arith.constant 0 : index
      %50 = vector.load %arg1[%c0_34, %49, %c1_35, %c0_36] : memref<1x18x18x4xbf16, #tpu.memory_space<vmem>>, vector<1x8x16x4xbf16>
      %51 = vector.shape_cast %50 : vector<1x8x16x4xbf16> to vector<8x16x4xbf16>
      %52 = vector.shape_cast %51 : vector<8x16x4xbf16> to vector<128x4xbf16>
      %c16 = arith.constant 16 : index
      %c0_37 = arith.constant 0 : index
      %53 = vector.load %arg2[%c16, %c0_37] : memref<36x128xbf16, #tpu.memory_space<vmem>>, vector<4x128xbf16>
      %cst_38 = arith.constant dense<0.000000e+00> : vector<128x128xf32>
      %54 = tpu.matmul %52, %53, %cst_38 {dimension_numbers = #tpu.dot_dimension_numbers<[1], [0], [0], [1], [0, 0, 1, 1], [], []>} : vector<128x4xbf16>, vector<4x128xbf16>, vector<128x128xf32> -> vector<128x128xf32>
      %55 = arith.addf %47, %54 : vector<128x128xf32>
      %c1_i32_39 = arith.constant 1 : i32
      %56 = arith.addi %14, %c1_i32_39 : i32
      %c0_40 = arith.constant 0 : index
      %57 = arith.index_cast %56 : i32 to index
      %c2_41 = arith.constant 2 : index
      %c0_42 = arith.constant 0 : index
      %58 = vector.load %arg1[%c0_40, %57, %c2_41, %c0_42] : memref<1x18x18x4xbf16, #tpu.memory_space<vmem>>, vector<1x8x16x4xbf16>
      %59 = vector.shape_cast %58 : vector<1x8x16x4xbf16> to vector<8x16x4xbf16>
      %60 = vector.shape_cast %59 : vector<8x16x4xbf16> to vector<128x4xbf16>
      %c20 = arith.constant 20 : index
      %c0_43 = arith.constant 0 : index
      %61 = vector.load %arg2[%c20, %c0_43] : memref<36x128xbf16, #tpu.memory_space<vmem>>, vector<4x128xbf16>
      %cst_44 = arith.constant dense<0.000000e+00> : vector<128x128xf32>
      %62 = tpu.matmul %60, %61, %cst_44 {dimension_numbers = #tpu.dot_dimension_numbers<[1], [0], [0], [1], [0, 0, 1, 1], [], []>} : vector<128x4xbf16>, vector<4x128xbf16>, vector<128x128xf32> -> vector<128x128xf32>
      %63 = arith.addf %55, %62 : vector<128x128xf32>
      %c2_i32_45 = arith.constant 2 : i32
      %64 = arith.addi %14, %c2_i32_45 : i32
      %c0_46 = arith.constant 0 : index
      %65 = arith.index_cast %64 : i32 to index
      %c0_47 = arith.constant 0 : index
      %c0_48 = arith.constant 0 : index
      %66 = vector.load %arg1[%c0_46, %65, %c0_47, %c0_48] : memref<1x18x18x4xbf16, #tpu.memory_space<vmem>>, vector<1x8x16x4xbf16>
      %67 = vector.shape_cast %66 : vector<1x8x16x4xbf16> to vector<8x16x4xbf16>
      %68 = vector.shape_cast %67 : vector<8x16x4xbf16> to vector<128x4xbf16>
      %c24 = arith.constant 24 : index
      %c0_49 = arith.constant 0 : index
      %69 = vector.load %arg2[%c24, %c0_49] : memref<36x128xbf16, #tpu.memory_space<vmem>>, vector<4x128xbf16>
      %cst_50 = arith.constant dense<0.000000e+00> : vector<128x128xf32>
      %70 = tpu.matmul %68, %69, %cst_50 {dimension_numbers = #tpu.dot_dimension_numbers<[1], [0], [0], [1], [0, 0, 1, 1], [], []>} : vector<128x4xbf16>, vector<4x128xbf16>, vector<128x128xf32> -> vector<128x128xf32>
      %71 = arith.addf %63, %70 : vector<128x128xf32>
      %c2_i32_51 = arith.constant 2 : i32
      %72 = arith.addi %14, %c2_i32_51 : i32
      %c0_52 = arith.constant 0 : index
      %73 = arith.index_cast %72 : i32 to index
      %c1_53 = arith.constant 1 : index
      %c0_54 = arith.constant 0 : index
      %74 = vector.load %arg1[%c0_52, %73, %c1_53, %c0_54] : memref<1x18x18x4xbf16, #tpu.memory_space<vmem>>, vector<1x8x16x4xbf16>
      %75 = vector.shape_cast %74 : vector<1x8x16x4xbf16> to vector<8x16x4xbf16>
      %76 = vector.shape_cast %75 : vector<8x16x4xbf16> to vector<128x4xbf16>
      %c28 = arith.constant 28 : index
      %c0_55 = arith.constant 0 : index
      %77 = vector.load %arg2[%c28, %c0_55] : memref<36x128xbf16, #tpu.memory_space<vmem>>, vector<4x128xbf16>
      %cst_56 = arith.constant dense<0.000000e+00> : vector<128x128xf32>
      %78 = tpu.matmul %76, %77, %cst_56 {dimension_numbers = #tpu.dot_dimension_numbers<[1], [0], [0], [1], [0, 0, 1, 1], [], []>} : vector<128x4xbf16>, vector<4x128xbf16>, vector<128x128xf32> -> vector<128x128xf32>
      %79 = arith.addf %71, %78 : vector<128x128xf32>
      %c2_i32_57 = arith.constant 2 : i32
      %80 = arith.addi %14, %c2_i32_57 : i32
      %c0_58 = arith.constant 0 : index
      %81 = arith.index_cast %80 : i32 to index
      %c2_59 = arith.constant 2 : index
      %c0_60 = arith.constant 0 : index
      %82 = vector.load %arg1[%c0_58, %81, %c2_59, %c0_60] : memref<1x18x18x4xbf16, #tpu.memory_space<vmem>>, vector<1x8x16x4xbf16>
      %83 = vector.shape_cast %82 : vector<1x8x16x4xbf16> to vector<8x16x4xbf16>
      %84 = vector.shape_cast %83 : vector<8x16x4xbf16> to vector<128x4xbf16>
      %c32 = arith.constant 32 : index
      %c0_61 = arith.constant 0 : index
      %85 = vector.load %arg2[%c32, %c0_61] : memref<36x128xbf16, #tpu.memory_space<vmem>>, vector<4x128xbf16>
      %cst_62 = arith.constant dense<0.000000e+00> : vector<128x128xf32>
      %86 = tpu.matmul %84, %85, %cst_62 {dimension_numbers = #tpu.dot_dimension_numbers<[1], [0], [0], [1], [0, 0, 1, 1], [], []>} : vector<128x4xbf16>, vector<4x128xbf16>, vector<128x128xf32> -> vector<128x128xf32>
      %87 = arith.addf %79, %86 : vector<128x128xf32>
      %cst_63 = arith.constant 0.000000e+00 : f32
      %88 = vector.broadcast %cst_63 : f32 to vector<128x128xf32>
      %89 = arith.maximumf %87, %88 : vector<128x128xf32>
      %cst_64 = arith.constant dense<0.000000e+00> : vector<128xf32>
      %90 = vector.multi_reduction <add>, %89, %cst_64 [0] : vector<128x128xf32> to vector<128xf32>
      %91 = vector.shape_cast %90 : vector<128xf32> to vector<1x128xf32>
      %92 = arith.addf %arg7, %91 : vector<1x128xf32>
      scf.yield %92 : vector<1x128xf32>
    }
    %c2_i32_0 = arith.constant 2 : i32
    %cst_1 = arith.constant 3.906250e-03 : f32
    %3 = vector.broadcast %cst_1 : f32 to vector<1x128xf32>
    %4 = arith.mulf %2, %3 : vector<1x128xf32>
    %5 = arith.truncf %4 : vector<1x128xf32> to vector<1x128xbf16>
    %c0 = arith.constant 0 : index
    %c0_2 = arith.constant 0 : index
    %6 = vector.load %arg3[%c0, %c0_2] : memref<128x128xbf16, #tpu.memory_space<vmem>>, vector<128x128xbf16>
    %cst_3 = arith.constant dense<0.000000e+00> : vector<1x128xf32>
    %7 = tpu.matmul %5, %6, %cst_3 {dimension_numbers = #tpu.dot_dimension_numbers<[1], [0], [0], [1], [0, 0, 1, 1], [], []>} : vector<1x128xbf16>, vector<128x128xbf16>, vector<1x128xf32> -> vector<1x128xf32>
    %c0_4 = arith.constant 0 : index
    %c0_5 = arith.constant 0 : index
    %8 = vector.load %arg4[%c0_4, %c0_5] : memref<1x128xf32, #tpu.memory_space<vmem>>, vector<1x128xf32>
    %9 = arith.addf %7, %8 : vector<1x128xf32>
    %c0_6 = arith.constant 0 : index
    %c0_7 = arith.constant 0 : index
    %c0_8 = arith.constant 0 : index
    %10 = vector.load %arg5[%c0_6, %c0_7, %c0_8] : memref<1x1x128xf32, #tpu.memory_space<vmem>>, vector<1x1x128xf32>
    %11 = vector.shape_cast %10 : vector<1x1x128xf32> to vector<1x128xf32>
    %12 = vector.shape_cast %9 : vector<1x128xf32> to vector<1x1x128xf32>
    tpu.vector_store %arg5[%c0_6, %c0_7, %c0_8], %12 {strides = array<i32>} : memref<1x1x128xf32, #tpu.memory_space<vmem>>, vector<1x1x128xf32>,
    return
  }
  func.func @transform_0(%arg0: i32) -> (i32, i32, i32, i32) {
    %c0_i32 = arith.constant 0 : i32
    %c0_i32_0 = arith.constant 0 : i32
    %c0_i32_1 = arith.constant 0 : i32
    %c0_i32_2 = arith.constant 0 : i32
    return %arg0, %c0_i32, %c0_i32_0, %c0_i32_1 : i32, i32, i32, i32
  }
  func.func @transform_1(%arg0: i32) -> (i32, i32) {
    %c0_i32 = arith.constant 0 : i32
    %c0_i32_0 = arith.constant 0 : i32
    %c0_i32_1 = arith.constant 0 : i32
    return %c0_i32, %c0_i32_0 : i32, i32
  }
  func.func @transform_2(%arg0: i32) -> (i32, i32) {
    %c0_i32 = arith.constant 0 : i32
    %c0_i32_0 = arith.constant 0 : i32
    %c0_i32_1 = arith.constant 0 : i32
    return %c0_i32, %c0_i32_0 : i32, i32
  }
  func.func @transform_3(%arg0: i32) -> (i32, i32) {
    %c0_i32 = arith.constant 0 : i32
    %c0_i32_0 = arith.constant 0 : i32
    %c0_i32_1 = arith.constant 0 : i32
    return %c0_i32, %c0_i32_0 : i32, i32
  }
  func.func @transform_4(%arg0: i32) -> (i32, i32, i32) {
    %c0_i32 = arith.constant 0 : i32
    %c0_i32_0 = arith.constant 0 : i32
    %c0_i32_1 = arith.constant 0 : i32
    return %arg0, %c0_i32, %c0_i32_0 : i32, i32, i32
  }
}

</mosaic_0001>

<bundles_post_ra>
// kernel: tpu_custom_call.1
= control target key start
LH: loop header
LB: loop body
LE: loop exit
PB: predicated region body
PF: predicated region fallthrough
CT: control target
= control target key end

     0   :  { %9 = vsyncpa [#allocation3], 0  ;;  %s3862_s0 = inlined_call_operand.vmem [shape: bf16[2,18,18,4], index: 0, kind: input, shape index: {}]   ;;  %s3863_s1 = inlined_call_operand.vmem [shape: bf16[36,128], index: 1, kind: input, shape index: {}]   ;;  %s3864_s2 = inlined_call_operand.vmem [shape: bf16[128,128], index: 2, kind: input, shape index: {}]   ;;  %s3865_s3 = inlined_call_operand.vmem [shape: f32[1,128], index: 3, kind: input, shape index: {}]   ;;  %s3866_s4 = inlined_call_operand.hbm [shape: f32[2,1,128], index: 4, kind: output, shape index: {}]  }
   0x1   :  { %11 = vsyncpa [#allocation3 + $0x1], 0  ;;  %s2980_s15 = smov 0   ;;  %s2982_s16 = smov 0  }
   0x2   :  { %s2984_s17 = smov 0   ;;  %s2986_s18 = smov 0  }
   0x3 LB: > { %s3001_s19 = sadd.s32 4294967295, %s2945_s18   ;;  %s2449_s20 = sadd.s32 4294967294, %s2945_s18   ;;  %s2945_s18 = sphi %s2986_s18, %s3877_s18   ;;  %s2941_s17 = sphi %s2984_s17, %s3876_s17   ;;  %s2937_s16 = sphi %s2982_s16, %s3875_s16   ;;  %s2933_s15 = sphi %s2980_s15, %s3874_s15  }
   0x4   : > { %s3005_s21 = sadd.s32 1, %s2945_s18   ;;  %s113_s22 = sadd.s32 1, %s2941_s17 }
   0x5   : > { %s110_s23 = ssub.s32 %s2945_s18, %s3005_s21  ;;  %p123_p0 = scmp.ne.s32.totalorder %s2941_s17, %s2937_s16 }
   0x6   : > { %p111_p1 = scmp.eq.s32.totalorder %s110_s23, 0  ;;  %p124_p2 = scmp.eq.s32.totalorder %s3001_s19, 1 }
   0x7   : > { %p129_p3 = scmp.ne.s32.totalorder %s2937_s16, %s2933_s15  ;;  %p130_p4 = scmp.eq.s32.totalorder %s2449_s20, 1 }
   0x8   : > { %s3016_s24 = scalar_select %p111_p1, %s2941_s17, %s113_s22  }
   0x9   : > { %p3018_p5 = por %p124_p2, %p123_p0  ;;  %p3022_p6 = por %p130_p4, %p129_p3 }
   0xa   : > { %p2452_p7 = scmp.ge.s32.totalorder %s2945_s18, 1  ;;  %p165_p8 = scmp.lt.s32.totalorder %s2945_s18, 3 }
   0xc   : > { %p166_p9 = pnand %p2452_p7, %p165_p8 }
   0xd   : > { %s188_s27 = sand.u32 (!%p166_p9), 1, %s2937_s16   ;;  %p190_p10 = scmp.lt.s32.totalorder (!%p166_p9), %s3001_s19, 1 }
   0xe   : > { %169 = sbr.rel (%p166_p9) target bundleno = 648 (0x288), region = 36  ;;  %s3038_s7 = scalar_lea.vmem (!%p166_p9), [#allocation2], %s188_s27 }
   0xf   : > { %s3042_s8 = smov (!%p166_p9), 0  }
  0x13   : > { %s191_s28 = scalar_select %p190_p10, %s3001_s19, 1  ;;  %v3040_v0 = vmov 0.0  }
  0x15   : > { %s2819_s29 = smul.u32 216, %s191_s28 }
  0x17   : > { %s3034_s6 = scalar_lea.vmem %s3862_s0, %s2819_s29 }
  0x18 LB: >> { %v427_v1 = vld [vmem:[%s3863_s1] sm:$0xc]  ;;  %v733_v3 = vld [vmem:[%s3863_s1 + $0x4] sm:$0x3]  ;;  %v870_v4 = vld [vmem:[%s3863_s1 + $0x4] sm:$0xc]  ;;  %s2953_s8 = sphi %s3042_s8, %s201_s8   ;;  %v2949_v0 = vphi %v3040_v0, %v3873_v0  }
  0x19   : >> { %v453_v2 = vunpack.c.l.b16 %v427_v1  ;;  %s2783_s20 = smul.u32 96, %s2953_s8  ;;  %v223_v5 = vld [vmem:[%s3863_s1] sm:$0x3]  ;;  %v1223_v6 = vld [vmem:[%s3863_s1 + $0x8] sm:$0x3]  ;;  %vm481_vm0 = vcmask 1041408   ;;  %v912_v8 = vunpack.c.l.b16 %v870_v4 }
  0x1a   : >> { %vm232_vm1 = vsmask.f32 3328  ;;  %vm233_vm2 = vsmask.f32 7440  ;;  %v783_v9 = vsel %vm481_vm0, %v733_v3, 0  ;;  %v599_v10 = vsel %vm481_vm0, %v223_v5, 0 }
  0x1b   : >> { %v454_v7 = vpack.c.b16 %v453_v2, %v453_v2  ;;  %s3067_s30 = scalar_lea.vmem %s3034_s6, %s2783_s20  ;;  %v1273_v14 = vsel %vm481_vm0, %v1223_v6, 0  ;;  %v3087_v24 = vpack.c.b16 %v912_v8, %v912_v8  ;;  %vm456_vm3 = vcmask 31744   ;;  %vm3101_vm4 = vmor %vm232_vm1, %vm233_vm2  ;;  %s201_s8 = sadd.s32 1, %s2953_s8  }
  0x1c   : >> { %v211_v12 = vld [vmem:[%s3067_s30 + $0x18] sm:$0xf]  ;;  %v3073_v13 = vld [vmem:[%s3067_s30 + $0x1c] sm:$0xf]  ;;  %v3077_v15 = vld [vmem:[%s3067_s30 + $0x20] sm:$0x1] }
  0x1d   : >> { %v455_v11 = vrot.slane %v454_v7, 2  ;;  %v284_v16 = vshrl.u32 %v211_v12, 16  ;;  %v287_v17 = vshll.u32 %v211_v12, 16  ;;  %v293_v18 = vshll.u32 %v3073_v13, 16  ;;  %v215_v22 = vld [vmem:[%s3067_s30 + $0x30] sm:$0xf] }
  0x1e   : >> { %v297_v19 = vshrl.u32 %v3073_v13, 16  ;;  %v303_v21 = vshll.u32 %v3077_v15, 16  ;;  %v3085_v23 = vld [vmem:[%s3067_s30 + $0x34] sm:$0xf]  ;;  %v3090_v29 = vld [vmem:[%s3067_s30 + $0x38] sm:$0x1] }
  0x1f   : >> { %v483_v20 = vsel %vm481_vm0, %v455_v11, 0  ;;  %v286_v25 = vrot.slane %v284_v16, 4  ;;  %v289_v26 = vrot.slane %v287_v17, 5  ;;  %v295_v27 = vrot.slane %v293_v18, 5  ;;  %v219_v34 = vld [vmem:[%s3067_s30 + $0x48] sm:$0xf] }
  0x20   : >> { %2816 = vmatpush.bf16.msra.mxu1 %v483_v20  ;;  %2817 = vmatpush.bf16.msra.mxu2 %v483_v20  ;;  %v299_v28 = vrot.slane %v297_v19, 4  ;;  %v305_v30 = vrot.slane %v303_v21, 5  ;;  %v332_v31 = vshrl.u32 %v215_v22, 16  ;;  %v335_v32 = vshll.u32 %v215_v22, 16  ;;  %v3097_v39 = vld [vmem:[%s3067_s30 + $0x4c] sm:$0xf] }
  0x21   : >> { %2818 = vmatpush.bf16.msra.mxu3 %v483_v20  ;;  %492 = vmatpush.bf16.msra.mxu0 %v483_v20  ;;  %v341_v33 = vshll.u32 %v3085_v23, 16  ;;  %v290_v35 = vor.u32 %v289_v26, %v286_v25  ;;  %v345_v37 = vshrl.u32 %v3085_v23, 16  ;;  %v351_v38 = vshll.u32 %v3090_v29, 16  ;;  %v3106_v50 = vld [vmem:[%s3067_s30 + $0x50] sm:$0x1]  ;;  %p198_p11 = scmp.ge.s32.totalorder %s201_s8, 2  }
  0x22   : >> { %v300_v36 = vor.u32 %v299_v28, %v295_v27  ;;  %v334_v41 = vrot.slane %v332_v31, 4  ;;  %v337_v42 = vrot.slane %v335_v32, 5  ;;  %v380_v44 = vshrl.u32 %v219_v34, 16  ;;  %v207_v58 = vld [vmem:[%s3067_s30] sm:$0xf]  ;;  %s2372_s29 = scalar_lea.hbm (%p198_p11), %s3866_s4, %s3001_s19  ;;  %s2374_s9 = sshll.u32 (%p198_p11), %s3038_s7, 4  ;;  %s2375_s9 = int_to_ptr.vmem [resolvable:$true] %s2374_s9 }
  0x23   : >> { %v343_v43 = vrot.slane %v341_v33, 5  ;;  %v291_v45 = vrot.slane %v290_v35, 4  ;;  %v347_v47 = vrot.slane %v345_v37, 4  ;;  %v353_v48 = vrot.slane %v351_v38, 5  ;;  %v3119_v7 = vld [vmem:[%s3067_s30 + $0x4] sm:$0xf] }
  0x24   : >> { %792 = vmatpush.bf16.msrb.mxu2 %v783_v9  ;;  %608 = vmatpush.bf16.msrb.mxu1 %v599_v10  ;;  %v301_v46 = vrot.slane %v300_v36, 4  ;;  %v338_v49 = vor.u32 %v337_v42, %v334_v41  ;;  %v382_v51 = vrot.slane %v380_v44, 4  ;;  %v383_v52 = vshll.u32 %v219_v34, 16  ;;  %v3122_v8 = vld [vmem:[%s3067_s30 + $0x8] sm:$0x1]  ;;  %s2376_s10 = sshll.u32 (%p198_p11), %s2372_s29, 4  ;;  %s2377_s10 = int_to_ptr.hbm [resolvable:$true] %s2376_s10 }
  0x25   : >> { %1282 = vmatpush.bf16.msrb.mxu0 %v1273_v14  ;;  %v389_v53 = vshll.u32 %v3097_v39, 16  ;;  %v296_v54 = vsel %vm3101_vm4, %v291_v45, %v295_v27  ;;  %v348_v56 = vor.u32 %v347_v47, %v343_v43  ;;  %v393_v57 = vshrl.u32 %v3097_v39, 16  ;;  %v213_v31 = vld [vmem:[%s3067_s30 + $0x24] sm:$0xf]  ;;  %v3135_v32 = vld [vmem:[%s3067_s30 + $0x28] sm:$0xf] }
  0x26   : >> { %v306_v55 = vsel %vm3101_vm4, %v301_v46, %v305_v30  ;;  %v432_v59 = vunpack.c.l.b16 %v296_v54  ;;  %v339_v61 = vrot.slane %v338_v49, 4  ;;  %v385_v62 = vrot.slane %v383_v52, 5  ;;  %s2364_s6 = scalar_lea.sflag (%p198_p11), [#allocation3], %s188_s27  ;;  %s2889_s8 = sshra.s32 (%p198_p11), %s2377_s10, 4  ;;  %s2890_s8 = int_to_ptr.hbm [resolvable:$true] %s2889_s8 }
  0x27   : >> { %v433_v60 = vunpack.c.l.b16 %v306_v55  ;;  %v349_v63 = vrot.slane %v348_v56, 4  ;;  %v391_v1 = vrot.slane %v389_v53, 5  ;;  %v395_v2 = vrot.slane %v393_v57, 4  ;;  %s2891_s11 = scalar_lea.hbm (%p198_p11), %s2890_s8, 1  ;;  %s2895_s13 = scalar_lea.hbm (%p198_p11), %s3866_s4, 2 }
  0x28   : >> { %v399_v3 = vshll.u32 %v3106_v50, 16  ;;  %v344_v5 = vsel %vm3101_vm4, %v339_v61, %v343_v43  ;;  %v386_v6 = vor.u32 %v385_v62, %v382_v51  ;;  %v236_v9 = vshrl.u32 %v207_v58, 16  ;;  %v3142_v43 = vld [vmem:[%s3067_s30 + $0x2c] sm:$0x1]  ;;  %p2892_p12 = scmp.ne.s32.totalorder (%p198_p11), %s2890_s8, %s2891_s11  ;;  %p2896_p1 = scmp.lt.s32.totalorder (%p198_p11), %s2890_s8, %s3866_s4 }
  0x29   : >> { %v446_v4 = vpack.c.b16 %v433_v60, %v432_v59  ;;  %v354_v10 = vsel %vm3101_vm4, %v349_v63, %v353_v48  ;;  %v436_v11 = vunpack.c.l.b16 %v344_v5  ;;  %v396_v12 = vor.u32 %v395_v2, %v391_v1  ;;  %v217_v48 = vld [vmem:[%s3067_s30 + $0x3c] sm:$0xf]  ;;  %v3153_v60 = vld [vmem:[%s3067_s30 + $0x40] sm:$0xf]  ;;  %v3158_v2 = vld [vmem:[%s3067_s30 + $0x44] sm:$0x1]  ;;  %p2897_p2 = scmp.lt.s32.totalorder (%p198_p11), %s2895_s13, %s2891_s11 }
  0x2a   : >> { %v401_v14 = vrot.slane %v399_v3, 5  ;;  %v437_v16 = vunpack.c.l.b16 %v354_v10  ;;  %v387_v17 = vrot.slane %v386_v6, 4  ;;  %v238_v18 = vrot.slane %v236_v9, 4  ;;  %p2893_p13 = pnand (%p198_p11), %p2892_p12, %p3018_p5 }
  0x2b   : >> { %2459 = vmatmul.msk.bf16.vlgmr.msra.gmra.mxu1 %vm456_vm3, %v446_v4  ;;  %v239_v19 = vshll.u32 %v207_v58, 16  ;;  %v397_v20 = vrot.slane %v396_v12, 4  ;;  %v245_v21 = vshll.u32 %v3119_v7, 16  ;;  %v249_v22 = vshrl.u32 %v3119_v7, 16  ;;  %v221_v4 = vld [vmem:[%s3067_s30 + $0x54] sm:$0xf]  ;;  %p2898_p3 = por (%p198_p11), %p2897_p2, %p2896_p1 }
  0x2c   : >> { %v255_v25 = vshll.u32 %v3122_v8, 16  ;;  %v448_v26 = vpack.c.b16 %v437_v16, %v436_v11  ;;  %v392_v27 = vsel %vm3101_vm4, %v387_v17, %v391_v1  ;;  %v682_v30 = vrot.slane %v3122_v8, 5  ;;  %p2894_p0 = pneg (%p198_p11), %p2893_p13 }
  0x2d   : >> { %v241_v28 = vrot.slane %v239_v19, 5  ;;  %v402_v33 = vsel %vm3101_vm4, %v397_v20, %v401_v14  ;;  %v440_v34 = vunpack.c.l.b16 %v392_v27  ;;  %v247_v35 = vrot.slane %v245_v21, 5  ;;  %v3165_v20 = vld [vmem:[%s3067_s30 + $0x58] sm:$0xf] }
  0x2e   : >> { %v251_v36 = vrot.slane %v249_v22, 4  ;;  %2461 = vmatmul.msk.bf16.vlgmr.msra.gmra.mxu2 %vm456_vm3, %v448_v26  ;;  %v441_v37 = vunpack.c.l.b16 %v402_v33  ;;  %v257_v41 = vrot.slane %v255_v25, 5  ;;  %v914_v42 = vrot.slane %v3087_v24, 2  ;;  %p2899_p4 = pnand (%p198_p11), %p2898_p3, %p2894_p0 }
  0x2f   : >> { %v242_v38 = vor.u32 %v241_v28, %v238_v18  ;;  %v308_v45 = vshrl.u32 %v213_v31, 16  ;;  %v311_v46 = vshll.u32 %v213_v31, 16  ;;  %v317_v47 = vshll.u32 %v3135_v32, 16  ;;  %v3170_v28 = vld [vmem:[%s3067_s30 + $0x5c] sm:$0x1] }
  0x30   : >> { %v252_v44 = vor.u32 %v251_v36, %v247_v35  ;;  %v450_v49 = vpack.c.b16 %v441_v37, %v440_v34  ;;  %v940_v52 = vsel %vm481_vm0, %v914_v42, 0  ;;  %v321_v53 = vshrl.u32 %v3135_v32, 16  ;;  %v209_v31 = vld [vmem:[%s3067_s30 + $0xc] sm:$0xf] }
  0x31   : >> { %v243_v51 = vrot.slane %v242_v38, 4  ;;  %949 = vmatpush.bf16.msrb.mxu3 %v940_v52  ;;  %v310_v24 = vrot.slane %v308_v45, 4  ;;  %v313_v55 = vrot.slane %v311_v46, 5  ;;  %v319_v56 = vrot.slane %v317_v47, 5 }
  0x32   : >> { %v253_v54 = vrot.slane %v252_v44, 4  ;;  %2463 = vmatmul.msk.bf16.vlgmr.msra.gmra.mxu3 %vm456_vm3, %v450_v49  ;;  %v323_v58 = vrot.slane %v321_v53, 4  ;;  %v327_v59 = vshll.u32 %v3142_v43, 16  ;;  %v356_v61 = vshrl.u32 %v217_v48, 16  ;;  %v3182_v53 = vld [vmem:[%s3067_s30 + $0x10] sm:$0xf] }
  0x33   : >> { %v248_v57 = vsel %vm3101_vm4, %v243_v51, %v247_v35  ;;  %v314_v1 = vor.u32 %v313_v55, %v310_v24  ;;  %v359_v3 = vshll.u32 %v217_v48, 16  ;;  %v365_v14 = vshll.u32 %v3153_v60, 16 }
  0x34   : >> { %v258_v62 = vsel %vm3101_vm4, %v253_v54, %v257_v41  ;;  %v428_v63 = vunpack.c.l.b16 %v248_v57  ;;  %v324_v6 = vor.u32 %v323_v58, %v319_v56  ;;  %v329_v9 = vrot.slane %v327_v59, 5  ;;  %v3185_v57 = vld [vmem:[%s3067_s30 + $0x14] sm:$0x1] }
  0x35   : >> { %v429_v5 = vunpack.c.l.b16 %v258_v62  ;;  %v358_v10 = vrot.slane %v356_v61, 4  ;;  %v315_v11 = vrot.slane %v314_v1, 4  ;;  %v361_v12 = vrot.slane %v359_v3, 5 }
  0x36   : >> { %v369_v16 = vshrl.u32 %v3153_v60, 16  ;;  %v325_v18 = vrot.slane %v324_v6, 4  ;;  %v375_v19 = vshll.u32 %v3158_v2, 16  ;;  %v404_v21 = vshrl.u32 %v221_v4, 16 }
  0x37   : >> { %v444_v17 = vpack.c.b16 %v429_v5, %v428_v63  ;;  %v320_v22 = vsel %vm3101_vm4, %v315_v11, %v319_v56  ;;  %v362_v25 = vor.u32 %v361_v12, %v358_v10  ;;  %v367_v26 = vrot.slane %v365_v14, 5  ;;  %v650_v10 = vld [vmem:[%s3067_s30] sm:$0xe] }
  0x38   : >> { %v371_v27 = vrot.slane %v369_v16, 4  ;;  %v330_v33 = vsel %vm3101_vm4, %v325_v18, %v329_v9  ;;  %v434_v34 = vunpack.c.l.b16 %v320_v22  ;;  %v377_v35 = vrot.slane %v375_v19, 5  ;;  %v2579_v22 = vld [vmem:[%s3067_s30 + $0xc] sm:$0xf] }
  0x39   : >> { %2457 = vmatmul.msk.bf16.vlgmr.msra.gmra.mxu0 %vm456_vm3, %v444_v17  ;;  %v406_v36 = vrot.slane %v404_v21, 4  ;;  %v435_v37 = vunpack.c.l.b16 %v330_v33  ;;  %v363_v38 = vrot.slane %v362_v25, 4  ;;  %v407_v42 = vshll.u32 %v221_v4, 16  ;;  %v1569_v17 = vld [vmem:[%s3863_s1 + $0xc] sm:$0x3] }
  0x3a   : >> { %v372_v41 = vor.u32 %v371_v27, %v367_v26  ;;  %v413_v44 = vshll.u32 %v3165_v20, 16  ;;  %v417_v45 = vshrl.u32 %v3165_v20, 16  ;;  %v423_v46 = vshll.u32 %v3170_v28, 16  ;;  %v3201_v25 = vld [vmem:[%s3067_s30 + $0x10] sm:$0xf] }
  0x3b   : >> { %v260_v47 = vshrl.u32 %v209_v31, 16  ;;  %v447_v48 = vpack.c.b16 %v435_v37, %v434_v34  ;;  %v368_v49 = vsel %vm3101_vm4, %v363_v38, %v367_v26  ;;  %v409_v52 = vrot.slane %v407_v42, 5 }
  0x3c   : >> { %v373_v51 = vrot.slane %v372_v41, 4  ;;  %v438_v54 = vunpack.c.l.b16 %v368_v49  ;;  %v415_v24 = vrot.slane %v413_v44, 5  ;;  %v419_v55 = vrot.slane %v417_v45, 4  ;;  %v3217_v49 = vld [vmem:[%s3067_s30 + $0x14] sm:$0x1] }
  0x3d   : >> { %v425_v56 = vrot.slane %v423_v46, 5  ;;  %2460 = vmatmul.msk.bf16.gmra.mxu1 %vm456_vm3, %v447_v48  ;;  %v410_v59 = vor.u32 %v409_v52, %v406_v36  ;;  %v262_v61 = vrot.slane %v260_v47, 4  ;;  %v263_v62 = vshll.u32 %v209_v31, 16 }
  0x3e   : >> { %v378_v58 = vsel %vm3101_vm4, %v373_v51, %v377_v35  ;;  %v420_v1 = vor.u32 %v419_v55, %v415_v24  ;;  %v269_v3 = vshll.u32 %v3182_v53, 16  ;;  %v273_v4 = vshrl.u32 %v3182_v53, 16 }
  0x3f   : >> { %v439_v63 = vunpack.c.l.b16 %v378_v58  ;;  %v411_v5 = vrot.slane %v410_v59, 4  ;;  %v265_v6 = vrot.slane %v263_v62, 5  ;;  %v279_v9 = vshll.u32 %v3185_v57, 16 }
  0x40   : >> { %vm674_vm5 = vcmask 1042432   ;;  %v421_v12 = vrot.slane %v420_v1, 4  ;;  %v271_v14 = vrot.slane %v269_v3, 5  ;;  %v275_v16 = vrot.slane %v273_v4, 4  ;;  %v2784_v4 = vld [vmem:[%s3067_s30] sm:$0xff] }
  0x41   : >> { %v449_v11 = vpack.c.b16 %v439_v63, %v438_v54  ;;  %v416_v18 = vsel %vm3101_vm4, %v411_v5, %v415_v24  ;;  %v266_v19 = vor.u32 %v265_v6, %v262_v61  ;;  %v281_v21 = vrot.slane %v279_v9, 5  ;;  %v1918_v54 = vld [vmem:[%s3863_s1 + $0xc] sm:$0xc]  ;;  %v1428_v24 = vld [vmem:[%s3863_s1 + $0x8] sm:$0xc] }
  0x42   : >> { %vm675_vm6 = vcmask 1046532   ;;  %v426_v26 = vsel %vm3101_vm4, %v421_v12, %v425_v56  ;;  %v442_v27 = vunpack.c.l.b16 %v416_v18  ;;  %v276_v31 = vor.u32 %v275_v16, %v271_v14  ;;  %v2127_v61 = vld [vmem:[%s3863_s1 + $0x10] sm:$0x3] }
  0x43   : >> { %2462 = vmatmul.msk.bf16.gmra.mxu2 %vm456_vm3, %v449_v11  ;;  %v2505_v33 = vrot.slane %v650_v10, 9  ;;  %v443_v34 = vunpack.c.l.b16 %v426_v26  ;;  %v267_v35 = vrot.slane %v266_v19, 4  ;;  %v679_v36 = vrot.slane %v3119_v7, 5  ;;  %vm3209_vm7 = vmor %vm674_vm5, %vm675_vm6  ;;  %v3245_v26 = vld [vmem:[%s3067_s30 + $0x1c] sm:$0xf] }
  0x44   : >> { %v1635_v37 = vsel %vm481_vm0, %v1569_v17, 0  ;;  %v277_v38 = vrot.slane %v276_v31, 4  ;;  %v1032_v42 = vshrl.u32 %v2579_v22, 16  ;;  %v1035_v44 = vshll.u32 %v2579_v22, 16  ;;  %v2582_v17 = vld [vmem:[%s3067_s30 + $0x18] sm:$0xf] }
  0x45   : >> { %1644 = vmatpush.bf16.msra.mxu2 %v1635_v37  ;;  %v1041_v45 = vshll.u32 %v3201_v25, 16  ;;  %v451_v46 = vpack.c.b16 %v443_v34, %v442_v27  ;;  %v272_v47 = vsel %vm3101_vm4, %v267_v35, %v271_v14  ;;  %v681_v48 = vrot.slane %v679_v36, 4 }
  0x46   : >> { %v282_v7 = vsel %vm3101_vm4, %v277_v38, %v281_v21  ;;  %v430_v51 = vunpack.c.l.b16 %v272_v47  ;;  %v1034_v52 = vrot.slane %v1032_v42, 4  ;;  %v680_v56 = vsel %vm3209_vm7, %v2505_v33, %v679_v36  ;;  %v651_v33 = vld [vmem:[%s3067_s30 + $0xc] sm:$0xe] }
  0x47   : >> { %2464 = vmatmul.msk.bf16.gmra.mxu3 %vm456_vm3, %v451_v46  ;;  %v431_v55 = vunpack.c.l.b16 %v282_v7  ;;  %v683_v58 = vsel %vm3209_vm7, %v681_v48, %v682_v30  ;;  %v1037_v59 = vrot.slane %v1035_v44, 5  ;;  %v1043_v62 = vrot.slane %v1041_v45, 5  ;;  %v652_v44 = vld [vmem:[%s3067_s30 + $0x18] sm:$0xe] }
  0x48   : >> { %v1045_v63 = vshrl.u32 %v3201_v25, 16  ;;  %v1051_v1 = vshll.u32 %v3217_v49, 16  ;;  %v1944_v6 = vunpack.c.l.b16 %v1918_v54  ;;  %v1454_v9 = vunpack.c.l.b16 %v1428_v24  ;;  %v2792_v24 = vld [vmem:[%s3067_s30 + $0xc] sm:$0xff] }
  0x49   : >> { %v445_v3 = vpack.c.b16 %v431_v55, %v430_v51  ;;  %v1038_v5 = vor.u32 %v1037_v59, %v1034_v52  ;;  %v734_v8 = vunpack.c.l.b16 %v680_v56  ;;  %v735_v10 = vunpack.c.l.b16 %v683_v58 }
  0x4a   : >> { %v1047_v30 = vrot.slane %v1045_v63, 4  ;;  %v2177_v11 = vsel %vm481_vm0, %v2127_v61, 0  ;;  %v1945_v14 = vpack.c.b16 %v1944_v6, %v1944_v6  ;;  %v1455_v16 = vpack.c.b16 %v1454_v9, %v1454_v9 }
  0x4b   : >> { %2458 = vmatmul.msk.bf16.gmra.mxu0 %vm456_vm3, %v445_v3  ;;  %v1039_v12 = vrot.slane %v1038_v5, 4  ;;  %v1053_v19 = vrot.slane %v1051_v1, 5  ;;  %v750_v27 = vpack.c.b16 %v735_v10, %v734_v8  ;;  %v686_v34 = vrot.slane %v3182_v53, 5  ;;  %v3266_v1 = vld [vmem:[%s3067_s30 + $0x20] sm:$0x1] }
  0x4c   : >> { %v1048_v18 = vor.u32 %v1047_v30, %v1043_v62  ;;  %2186 = vmatpush.bf16.msra.mxu0 %v2177_v11  ;;  %v1946_v21 = vrot.slane %v1945_v14, 2  ;;  %v1456_v22 = vrot.slane %v1455_v16, 2  ;;  %v1056_v35 = vshrl.u32 %v2582_v17, 16  ;;  %v2785_v30 = vld [vmem:[%s3067_s30 + $0xc] sm:$0xff] }
  0x4d   : >> { %2497 = vmatmul.msk.bf16.vlgmr.msrb.gmra.mxu1 %vm456_vm3, %v2784_v4  ;;  %v1044_v36 = vsel %vm3101_vm4, %v1039_v12, %v1043_v62  ;;  %v1059_v42 = vshll.u32 %v2582_v17, 16  ;;  %v1065_v46 = vshll.u32 %v3245_v26, 16  ;;  %v2506_v47 = vrot.slane %v651_v33, 9  ;;  %v2585_v17 = vld [vmem:[%s3067_s30 + $0x24] sm:$0xf] }
  0x4e   : >> { %v1049_v31 = vrot.slane %v1048_v18, 4  ;;  %v1972_v37 = vsel %vm481_vm0, %v1946_v21, 0  ;;  %v1482_v38 = vsel %vm481_vm0, %v1456_v22, 0  ;;  %v689_v53 = vrot.slane %v3185_v57, 5  ;;  %v3280_v21 = vld [vmem:[%s3067_s30 + $0x28] sm:$0xf] }
  0x4f   : >> { %1981 = vmatpush.bf16.msra.mxu3 %v1972_v37  ;;  %1491 = vmatpush.bf16.msra.mxu1 %v1482_v38  ;;  %v1069_v48 = vshrl.u32 %v3245_v26, 16  ;;  %v1224_v7 = vunpack.c.l.b16 %v1044_v36  ;;  %v688_v51 = vrot.slane %v686_v34, 4  ;;  %v2507_v52 = vrot.slane %v652_v44, 9  ;;  %v653_v22 = vld [vmem:[%s3067_s30 + $0x24] sm:$0xe] }
  0x50   : >> { %v1054_v45 = vsel %vm3101_vm4, %v1049_v31, %v1053_v19  ;;  %v693_v54 = vrot.slane %v3073_v13, 5  ;;  %v1058_v56 = vrot.slane %v1056_v35, 4  ;;  %v1061_v58 = vrot.slane %v1059_v42, 5 }
  0x51   : >> { %v1225_v55 = vunpack.c.l.b16 %v1054_v45  ;;  %v1067_v59 = vrot.slane %v1065_v46, 5  ;;  %v1071_v61 = vrot.slane %v1069_v48, 4  ;;  %v696_v63 = vrot.slane %v3077_v15, 5 }
  0x52   : >> { %v694_v57 = vsel %vm3209_vm7, %v2507_v52, %v693_v54  ;;  %v695_v62 = vrot.slane %v693_v54, 4  ;;  %v687_v13 = vsel %vm3209_vm7, %v2506_v47, %v686_v34  ;;  %v690_v6 = vsel %vm3209_vm7, %v688_v51, %v689_v53 }
  0x53   : >> { %2513 = vmatmul.msk.bf16.vlgmr.msrb.gmra.mxu2 %vm456_vm3, %v750_v27  ;;  %v738_v3 = vunpack.c.l.b16 %v694_v57  ;;  %v1240_v5 = vpack.c.b16 %v1225_v55, %v1224_v7  ;;  %v1062_v9 = vor.u32 %v1061_v58, %v1058_v56  ;;  %v1072_v8 = vor.u32 %v1071_v61, %v1067_v59  ;;  %v2793_v7 = vld [vmem:[%s3067_s30 + $0x18] sm:$0xff]  ;;  %v3299_v55 = vld [vmem:[%s3067_s30 + $0x2c] sm:$0x1] }
  0x54   : >> { %v697_v4 = vsel %vm3209_vm7, %v695_v62, %v696_v63  ;;  %v1075_v10 = vshll.u32 %v3266_v1, 16  ;;  %v736_v12 = vunpack.c.l.b16 %v687_v13  ;;  %v737_v14 = vunpack.c.l.b16 %v690_v6  ;;  %v2786_v62 = vld [vmem:[%s3067_s30 + $0x18] sm:$0xff] }
  0x55   : >> { %v739_v15 = vunpack.c.l.b16 %v697_v4  ;;  %v1063_v16 = vrot.slane %v1062_v9, 4  ;;  %v1073_v18 = vrot.slane %v1072_v8, 4  ;;  %v700_v27 = vrot.slane %v3135_v32, 5  ;;  %v2588_v4 = vld [vmem:[%s3067_s30 + $0x30] sm:$0xf] }
  0x56   : >> { %v1077_v19 = vrot.slane %v1075_v10, 5  ;;  %v703_v31 = vrot.slane %v3142_v43, 5  ;;  %v751_v33 = vpack.c.b16 %v737_v14, %v736_v12  ;;  %v1080_v34 = vshrl.u32 %v2585_v17, 16  ;;  %v2794_v12 = vld [vmem:[%s3067_s30 + $0x24] sm:$0xff] }
  0x57   : >> { %2571 = vmatmul.msk.bf16.vlgmr.msrb.gmra.mxu3 %vm456_vm3, %v2792_v24  ;;  %v752_v11 = vpack.c.b16 %v739_v15, %v738_v3  ;;  %v1083_v35 = vshll.u32 %v2585_v17, 16  ;;  %v2508_v36 = vrot.slane %v653_v22, 9  ;;  %v1068_v37 = vsel %vm3101_vm4, %v1063_v16, %v1067_v59 }
  0x58   : >> { %v1089_v38 = vshll.u32 %v3280_v21, 16  ;;  %v1093_v42 = vshrl.u32 %v3280_v21, 16  ;;  %v702_v44 = vrot.slane %v700_v27, 4  ;;  %v1078_v45 = vsel %vm3101_vm4, %v1073_v18, %v1077_v19 }
  0x59   : >> { %v701_v32 = vsel %vm3209_vm7, %v2508_v36, %v700_v27  ;;  %v1226_v47 = vunpack.c.l.b16 %v1068_v37  ;;  %v1082_v53 = vrot.slane %v1080_v34, 4  ;;  %v1227_v51 = vunpack.c.l.b16 %v1078_v45  ;;  %v3319_v27 = vld [vmem:[%s3067_s30 + $0x38] sm:$0x1]  ;;  %v2591_v36 = vld [vmem:[%s3067_s30 + $0x3c] sm:$0xf] }
  0x5a   : >> { %v704_v43 = vsel %vm3209_vm7, %v702_v44, %v703_v31  ;;  %v740_v46 = vunpack.c.l.b16 %v701_v32  ;;  %v1085_v52 = vrot.slane %v1083_v35, 5  ;;  %v1091_v54 = vrot.slane %v1089_v38, 5  ;;  %v3327_v37 = vld [vmem:[%s3067_s30 + $0x40] sm:$0xf]  ;;  %v654_v45 = vld [vmem:[%s3067_s30 + $0x30] sm:$0xe] }
  0x5b   : >> { %2603 = vmatmul.msk.bf16.vlgmr.msrb.gmra.mxu0 %vm456_vm3, %v1240_v5  ;;  %v741_v48 = vunpack.c.l.b16 %v704_v43  ;;  %v1095_v24 = vrot.slane %v1093_v42, 4  ;;  %v1241_v58 = vpack.c.b16 %v1227_v51, %v1226_v47  ;;  %v1099_v57 = vshll.u32 %v3299_v55, 16  ;;  %v3308_v5 = vld [vmem:[%s3067_s30 + $0x34] sm:$0xf] }
  0x5c   : >> { %v1086_v59 = vor.u32 %v1085_v52, %v1082_v53  ;;  %v1104_v15 = vshrl.u32 %v2588_v4, 16  ;;  %v1107_v8 = vshll.u32 %v2588_v4, 16  ;;  %v1113_v10 = vshll.u32 %v3308_v5, 16 }
  0x5d   : >> { %2498 = vmatmul.msk.bf16.gmra.mxu1 %vm456_vm3, %v2785_v30  ;;  %v753_v56 = vpack.c.b16 %v741_v48, %v740_v46  ;;  %v1096_v61 = vor.u32 %v1095_v24, %v1091_v54  ;;  %v1101_v13 = vrot.slane %v1099_v57, 5  ;;  %v1117_v30 = vshrl.u32 %v3308_v5, 16 }
  0x5e   : >> { %v1087_v63 = vrot.slane %v1086_v59, 4  ;;  %v1106_v17 = vrot.slane %v1104_v15, 4  ;;  %v1109_v18 = vrot.slane %v1107_v8, 5  ;;  %v1115_v19 = vrot.slane %v1113_v10, 5  ;;  %v2795_v59 = vld [vmem:[%s3067_s30 + $0x30] sm:$0xff] }
  0x5f   : >> { %v1097_v3 = vrot.slane %v1096_v61, 4  ;;  %v1119_v22 = vrot.slane %v1117_v30, 4  ;;  %v1123_v35 = vshll.u32 %v3319_v27, 16  ;;  %v1128_v32 = vshrl.u32 %v2591_v36, 16  ;;  %v2788_v15 = vld [vmem:[%s3067_s30 + $0x30] sm:$0xff] }
  0x60   : >> { %v1092_v6 = vsel %vm3101_vm4, %v1087_v63, %v1091_v54  ;;  %v1131_v43 = vshll.u32 %v2591_v36, 16  ;;  %v1137_v46 = vshll.u32 %v3327_v37, 16  ;;  %v1141_v47 = vshrl.u32 %v3327_v37, 16  ;;  %v3342_v63 = vld [vmem:[%s3067_s30 + $0x44] sm:$0x1] }
  0x61   : >> { %v1102_v9 = vsel %vm3101_vm4, %v1097_v3, %v1101_v13  ;;  %v1228_v14 = vunpack.c.l.b16 %v1092_v6  ;;  %v1120_v34 = vor.u32 %v1119_v22, %v1115_v19  ;;  %v1125_v44 = vrot.slane %v1123_v35, 5 }
  0x62   : >> { %v1229_v16 = vunpack.c.l.b16 %v1102_v9  ;;  %v707_v53 = vrot.slane %v3085_v23, 5  ;;  %v2509_v51 = vrot.slane %v654_v45, 9  ;;  %v1130_v52 = vrot.slane %v1128_v32, 4  ;;  %v2796_v32 = vld [vmem:[%s3067_s30 + $0x3c] sm:$0xff] }
  0x63   : >> { %2514 = vmatmul.msk.bf16.gmra.mxu2 %vm456_vm3, %v751_v33  ;;  %v1110_v33 = vor.u32 %v1109_v18, %v1106_v17  ;;  %v1121_v42 = vrot.slane %v1120_v34, 4  ;;  %v1133_v54 = vrot.slane %v1131_v43, 5  ;;  %v1139_v24 = vrot.slane %v1137_v46, 5 }
  0x64   : >> { %v1242_v31 = vpack.c.b16 %v1229_v16, %v1228_v14  ;;  %v710_v23 = vrot.slane %v3090_v29, 5  ;;  %v708_v3 = vsel %vm3209_vm7, %v2509_v51, %v707_v53  ;;  %v1147_v4 = vshll.u32 %v3342_v63, 16  ;;  %v2594_v14 = vld [vmem:[%s3067_s30 + $0x48] sm:$0xf]  ;;  %v3354_v16 = vld [vmem:[%s3067_s30 + $0x4c] sm:$0xf] }
  0x65   : >> { %v1111_v38 = vrot.slane %v1110_v33, 4  ;;  %v1134_v13 = vor.u32 %v1133_v54, %v1130_v52  ;;  %v742_v29 = vunpack.c.l.b16 %v708_v3  ;;  %v714_v22 = vrot.slane %v3153_v60, 5  ;;  %v3382_v3 = vld [vmem:[%s3067_s30 + $0x58] sm:$0xf] }
  0x66   : >> { %v1152_v33 = vshrl.u32 %v2594_v14, 16  ;;  %v1155_v34 = vshll.u32 %v2594_v14, 16  ;;  %v1161_v35 = vshll.u32 %v3354_v16, 16  ;;  %v717_v45 = vrot.slane %v3158_v2, 5 }
  0x67   : >> { %2572 = vmatmul.msk.bf16.gmra.mxu3 %vm456_vm3, %v2793_v7  ;;  %v1116_v48 = vsel %vm3101_vm4, %v1111_v38, %v1115_v19  ;;  %v1126_v7 = vsel %vm3101_vm4, %v1121_v42, %v1125_v44  ;;  %v1135_v10 = vrot.slane %v1134_v13, 4  ;;  %v716_v44 = vrot.slane %v714_v22, 4 }
  0x68   : >> { %v1230_v61 = vunpack.c.l.b16 %v1116_v48  ;;  %v1231_v57 = vunpack.c.l.b16 %v1126_v7  ;;  %v1154_v43 = vrot.slane %v1152_v33, 4  ;;  %v1157_v60 = vrot.slane %v1155_v34, 5  ;;  %v3396_v34 = vld [vmem:[%s3067_s30 + $0x5c] sm:$0x1] }
  0x69   : >> { %v1140_v18 = vsel %vm3101_vm4, %v1135_v10, %v1139_v24  ;;  %v1163_v46 = vrot.slane %v1161_v35, 5  ;;  %v718_v51 = vsel %vm3209_vm7, %v716_v44, %v717_v45  ;;  %v1189_v10 = vshrl.u32 %v3382_v3, 16  ;;  %v2790_v45 = vld [vmem:[%s3067_s30 + $0x48] sm:$0xff] }
  0x6a   : >> { %v1243_v6 = vpack.c.b16 %v1231_v57, %v1230_v61  ;;  %v1232_v36 = vunpack.c.l.b16 %v1140_v18  ;;  %v1158_v52 = vor.u32 %v1157_v60, %v1154_v43  ;;  %v1195_v44 = vshll.u32 %v3396_v34, 16 }
  0x6b   : >> { %2604 = vmatmul.msk.bf16.gmra.mxu0 %vm456_vm3, %v1241_v58  ;;  %v1143_v58 = vrot.slane %v1141_v47, 4  ;;  %v1191_v33 = vrot.slane %v1189_v10, 4 }
  0x6c   : >> { %v1159_v61 = vrot.slane %v1158_v52, 4 }
  0x6d   : >> { %2499 = vmatmul.msk.bf16.gmra.mxu1 %vm456_vm3, %v2786_v62  ;;  %v709_v62 = vrot.slane %v707_v53, 4  ;;  %v3369_v53 = vld [vmem:[%s3067_s30 + $0x50] sm:$0x1] }
  0x6e   : >> { %v1171_v54 = vshll.u32 %v3369_v53, 16 }
  0x6f   : >> { %v711_v9 = vsel %vm3209_vm7, %v709_v62, %v710_v23  ;;  %v2597_v23 = vld [vmem:[%s3067_s30 + $0x54] sm:$0xf] }
  0x70   : >> { %v743_v8 = vunpack.c.l.b16 %v711_v9  ;;  %v1173_v62 = vrot.slane %v1171_v54, 5  ;;  %v721_v9 = vrot.slane %v3097_v39, 5 }
  0x72   : >> { %v754_v17 = vpack.c.b16 %v743_v8, %v742_v29  ;;  %v656_v29 = vld [vmem:[%s3067_s30 + $0x48] sm:$0xe]  ;;  %v1185_v8 = vshll.u32 %v3382_v3, 16 }
  0x73   : >> { %2515 = vmatmul.msk.bf16.gmra.mxu2 %vm456_vm3, %v752_v11  ;;  %v2787_v11 = vld [vmem:[%s3067_s30 + $0x24] sm:$0xff]  ;;  %v2511_v18 = vrot.slane %v656_v29, 9  ;;  %v731_v29 = vrot.slane %v3170_v28, 5 }
  0x74   : >> { %v1187_v39 = vrot.slane %v1185_v8, 5 }
  0x77   : >> { %2573 = vmatmul.msk.bf16.gmra.mxu3 %vm456_vm3, %v2794_v12  ;;  %v1149_v12 = vrot.slane %v1147_v4, 5  ;;  %v1164_v4 = vsel %vm3101_vm4, %v1159_v61, %v1163_v46  ;;  %v657_v61 = vld [vmem:[%s3067_s30 + $0x54] sm:$0xe] }
  0x7b   : >> { %2605 = vmatmul.msk.bf16.gmra.mxu0 %vm456_vm3, %v1242_v31  ;;  %v655_v31 = vld [vmem:[%s3067_s30 + $0x3c] sm:$0xe] }
  0x7c   : >> { %v2510_v42 = vrot.slane %v655_v31, 9 }
  0x7d   : >> { %2500 = vmatmul.msk.bf16.gmra.mxu1 %vm456_vm3, %v2787_v11  ;;  %v1165_v11 = vshrl.u32 %v3354_v16, 16 }
  0x7e   : >> { %v715_v7 = vsel %vm3209_vm7, %v2510_v42, %v714_v22  ;;  %v724_v22 = vrot.slane %v3106_v50, 5  ;;  %v1192_v50 = vor.u32 %v1191_v33, %v1187_v39  ;;  %v3443_v33 = vld [vmem:[%s3067_s30 + $0x1c] sm:$0xf] }
  0x7f   : >> { %v1167_v47 = vrot.slane %v1165_v11, 4 }
  0x81   : >> { %v1168_v2 = vor.u32 %v1167_v47, %v1163_v46  ;;  %v2600_v46 = vld [vmem:[%s3067_s30 + $0x60] sm:$0xf]  ;;  %v1193_v47 = vrot.slane %v1192_v50, 4 }
  0x82   : >> { %v1200_v52 = vshrl.u32 %v2600_v46, 16 }
  0x83   : >> { %2516 = vmatmul.msk.bf16.gmra.mxu2 %vm456_vm3, %v753_v56  ;;  %v1144_v56 = vor.u32 %v1143_v58, %v1139_v24  ;;  %v2789_v24 = vld [vmem:[%s3067_s30 + $0x3c] sm:$0xff]  ;;  %v744_v58 = vunpack.c.l.b16 %v715_v7  ;;  %v1169_v57 = vrot.slane %v1168_v2, 4  ;;  %v3411_v7 = vld [vmem:[%s3067_s30 + $0x64] sm:$0xf]  ;;  %v1203_v2 = vshll.u32 %v2600_v46, 16 }
  0x84   : >> { %v1736_v46 = vshll.u32 %v3443_v33, 16 }
  0x85   : >> { %v1145_v30 = vrot.slane %v1144_v56, 4  ;;  %v1176_v56 = vshrl.u32 %v2597_v23, 16 }
  0x87   : >> { %2574 = vmatmul.msk.bf16.gmra.mxu3 %vm456_vm3, %v2795_v59  ;;  %v1150_v19 = vsel %vm3101_vm4, %v1145_v30, %v1149_v12  ;;  %v745_v59 = vunpack.c.l.b16 %v718_v51  ;;  %v1234_v30 = vunpack.c.l.b16 %v1164_v4  ;;  %v1178_v14 = vrot.slane %v1176_v56, 4 }
  0x88   : >> { %v1233_v38 = vunpack.c.l.b16 %v1150_v19  ;;  %v723_v19 = vrot.slane %v721_v9, 4  ;;  %v1202_v56 = vrot.slane %v1200_v52, 4  ;;  %v1205_v4 = vrot.slane %v1203_v2, 5 }
  0x89   : >> { %v755_v13 = vpack.c.b16 %v745_v59, %v744_v58  ;;  %v1377_v52 = vrot.slane %v3217_v49, 5 }
  0x8a   : >> { %v1244_v48 = vpack.c.b16 %v1233_v38, %v1232_v36  ;;  %v722_v36 = vsel %vm3209_vm7, %v2511_v18, %v721_v9  ;;  %v725_v38 = vsel %vm3209_vm7, %v723_v19, %v724_v22  ;;  %v2512_v9 = vrot.slane %v657_v61, 9 }
  0x8b   : >> { %2606 = vmatmul.msk.bf16.gmra.mxu0 %vm456_vm3, %v1243_v6  ;;  %v1174_v6 = vsel %vm3101_vm4, %v1169_v57, %v1173_v62  ;;  %v747_v43 = vunpack.c.l.b16 %v725_v38  ;;  %v1209_v57 = vshll.u32 %v3411_v7, 16  ;;  %v1213_v62 = vshrl.u32 %v3411_v7, 16 }
  0x8c   : >> { %v1235_v12 = vunpack.c.l.b16 %v1174_v6  ;;  %v2798_v6 = vld [vmem:[%s3067_s30 + $0x54] sm:$0xff] }
  0x8d   : >> { %2501 = vmatmul.msk.bf16.gmra.mxu1 %vm456_vm3, %v2788_v15  ;;  %v1179_v15 = vshll.u32 %v2597_v23, 16  ;;  %v1211_v8 = vrot.slane %v1209_v57, 5  ;;  %v1215_v10 = vrot.slane %v1213_v62, 4  ;;  %v1738_v62 = vrot.slane %v1736_v46, 5 }
  0x8e   : >> { %v1245_v35 = vpack.c.b16 %v1235_v12, %v1234_v30  ;;  %v3431_v12 = vld [vmem:[%s3067_s30 + $0x68] sm:$0x1] }
  0x8f   : >> { %v1181_v31 = vrot.slane %v1179_v15, 5  ;;  %v1216_v28 = vor.u32 %v1215_v10, %v1211_v8 }
  0x91   : >> { %v1182_v42 = vor.u32 %v1181_v31, %v1178_v14  ;;  %v1219_v31 = vshll.u32 %v3431_v12, 16 }
  0x93   : >> { %2517 = vmatmul.msk.bf16.gmra.mxu2 %vm456_vm3, %v754_v17  ;;  %v2797_v17 = vld [vmem:[%s3067_s30 + $0x48] sm:$0xff]  ;;  %v1183_v60 = vrot.slane %v1182_v42, 4 }
  0x95   : >> { %v1188_v54 = vsel %vm3101_vm4, %v1183_v60, %v1187_v39  ;;  %v2693_v39 = vld [vmem:[%s3067_s30 + $0x18] sm:$0xf] }
  0x96   : >> { %v1730_v60 = vshll.u32 %v2693_v39, 16 }
  0x97   : >> { %2575 = vmatmul.msk.bf16.gmra.mxu3 %vm456_vm3, %v2796_v32  ;;  %v746_v32 = vunpack.c.l.b16 %v722_v36 }
  0x98   : >> { %v1732_v57 = vrot.slane %v1730_v60, 5 }
  0x99   : >> { %v756_v51 = vpack.c.b16 %v747_v43, %v746_v32  ;;  %v2611_v32 = vld [vmem:[%s3067_s30 + $0xc] sm:$0xe]  ;;  %v1727_v43 = vshrl.u32 %v2693_v39, 16  ;;  %v3478_v39 = vld [vmem:[%s3067_s30 + $0x28] sm:$0xf] }
  0x9b   : >> { %2607 = vmatmul.msk.bf16.gmra.mxu0 %vm456_vm3, %v1244_v48  ;;  %v1197_v48 = vrot.slane %v1195_v44, 5  ;;  %v1374_v44 = vrot.slane %v3201_v25, 5  ;;  %v1729_v61 = vrot.slane %v1727_v43, 4  ;;  %v2073_v43 = vrot.slane %v3443_v33, 5 }
  0x9d   : >> { %2502 = vmatmul.msk.bf16.gmra.mxu1 %vm456_vm3, %v2789_v24  ;;  %v728_v24 = vrot.slane %v3165_v20, 5  ;;  %v1198_v58 = vsel %vm3101_vm4, %v1193_v47, %v1197_v48  ;;  %v1740_v47 = vshrl.u32 %v3443_v33, 16  ;;  %v1217_v48 = vrot.slane %v1216_v28, 4 }
  0x9e   : >> { %v1237_v20 = vunpack.c.l.b16 %v1198_v58  ;;  %v1376_v58 = vrot.slane %v1374_v44, 4  ;;  %v1733_v10 = vor.u32 %v1732_v57, %v1729_v61  ;;  %v2612_v57 = vld [vmem:[%s3067_s30 + $0x18] sm:$0xe] }
  0x9f   : >> { %v730_v15 = vrot.slane %v728_v24, 4  ;;  %v729_v19 = vsel %vm3209_vm7, %v2512_v9, %v728_v24  ;;  %v2619_v24 = vrot.slane %v2611_v32, 9  ;;  %v2725_v32 = vld [vmem:[%s3067_s30 + $0x18] sm:$0xe] }
  0xa0   : >> { %v748_v38 = vunpack.c.l.b16 %v729_v19  ;;  %v2733_v61 = vrot.slane %v2725_v32, 9 }
  0xa1   : >> { %v732_v22 = vsel %vm3209_vm7, %v730_v15, %v731_v29  ;;  %v1375_v9 = vsel %vm3209_vm7, %v2619_v24, %v1374_v44  ;;  %v1378_v15 = vsel %vm3209_vm7, %v1376_v58, %v1377_v52  ;;  %v2799_v29 = vld [vmem:[%s3067_s30 + $0x60] sm:$0xff] }
  0xa2   : >> { %v749_v42 = vunpack.c.l.b16 %v732_v22  ;;  %v1429_v22 = vunpack.c.l.b16 %v1375_v9  ;;  %v1430_v28 = vunpack.c.l.b16 %v1378_v15 }
  0xa3   : >> { %2518 = vmatmul.msk.bf16.gmra.mxu2 %vm456_vm3, %v755_v13  ;;  %v1236_v13 = vunpack.c.l.b16 %v1188_v54 }
  0xa4   : >> { %v757_v25 = vpack.c.b16 %v749_v42, %v748_v38  ;;  %v1734_v38 = vrot.slane %v1733_v10, 4 }
  0xa5   : >> { %v1246_v18 = vpack.c.b16 %v1237_v20, %v1236_v13  ;;  %v1742_v13 = vrot.slane %v1740_v47, 4  ;;  %v1445_v47 = vpack.c.b16 %v1430_v28, %v1429_v22 }
  0xa6   : >> { %v1739_v33 = vsel %vm3101_vm4, %v1734_v38, %v1738_v62 }
  0xa7   : >> { %2576 = vmatmul.msk.bf16.gmra.mxu3 %vm456_vm3, %v2797_v17  ;;  %v1206_v17 = vor.u32 %v1205_v4, %v1202_v56  ;;  %v2695_v4 = vld [vmem:[%s3067_s30 + $0x20] sm:$0x1] }
  0xa8   : >> { %v3399_v11 = vpop.f32.mrf.mxu1 }
  0xa9   : >> { %v1207_v50 = vrot.slane %v1206_v17, 4  ;;  %v1743_v17 = vor.u32 %v1742_v13, %v1738_v62  ;;  %v2075_v13 = vrot.slane %v2073_v43, 4  ;;  %v1384_v62 = vrot.slane %v3266_v1, 5 }
  0xab   : >> { %2608 = vmatmul.msk.bf16.gmra.mxu0 %vm456_vm3, %v1245_v35  ;;  %v2791_v35 = vld [vmem:[%s3067_s30 + $0x54] sm:$0xff]  ;;  %v1212_v54 = vsel %vm3101_vm4, %v1207_v50, %v1211_v8  ;;  %v1744_v42 = vrot.slane %v1743_v17, 4  ;;  %v3503_v17 = vld [vmem:[%s3067_s30 + $0x2c] sm:$0x1] }
  0xad   : >> { %2503 = vmatmul.msk.bf16.gmra.mxu1 %vm456_vm3, %v2790_v45 }
  0xb0   : >> { %v3418_v59 = vpop.f32.mrf.mxu1 }
  0xb1   : >> { %v3423_v23 = vpop.f32.mrf.mxu2 }
  0xb3   : >> { %2519 = vmatmul.msk.bf16.gmra.mxu2 %vm456_vm3, %v756_v51  ;;  %v1221_v51 = vrot.slane %v1219_v31, 5  ;;  %v2696_v31 = vld [vmem:[%s3067_s30 + $0x24] sm:$0xf] }
  0xb4   : >> { %v1751_v60 = vshrl.u32 %v2696_v31, 16  ;;  %v1754_v46 = vshll.u32 %v2696_v31, 16 }
  0xb5   : >> { %v3433_v14 = vpop.f32.mrf.mxu3  ;;  %v1222_v49 = vsel %vm3101_vm4, %v1217_v48, %v1221_v51  ;;  %v1760_v48 = vshll.u32 %v3478_v39, 16  ;;  %v1764_v51 = vshrl.u32 %v3478_v39, 16 }
  0xb6   : >> { %v3428_v30 = vpop.f32.mrf.mxu0  ;;  %v1239_v8 = vunpack.c.l.b16 %v1222_v49  ;;  %v2076_v49 = vrot.slane %v2695_v4, 5  ;;  %v1756_v9 = vrot.slane %v1754_v46, 5 }
  0xb7   : >> { %2577 = vmatmul.msk.bf16.gmra.mxu3 %vm456_vm3, %v2798_v6  ;;  %v1238_v6 = vunpack.c.l.b16 %v1212_v54  ;;  %v1381_v54 = vrot.slane %v3245_v26, 5  ;;  %v1762_v26 = vrot.slane %v1760_v48, 5 }
  0xb8   : >> { %v2077_v31 = vsel %vm3209_vm7, %v2075_v13, %v2076_v49  ;;  %v2726_v49 = vld [vmem:[%s3067_s30 + $0x24] sm:$0xe] }
  0xb9   : >> { %v3450_v45 = vpop.f32.mrf.mxu2  ;;  %v1383_v10 = vrot.slane %v1381_v54, 4 }
  0xba   : >> { %v3446_v36 = vpop.f32.mrf.mxu1 }
  0xbb   : >> { %2609 = vmatmul.msk.bf16.gmra.mxu0 %vm456_vm3, %v1246_v18  ;;  %v1746_v18 = vshll.u32 %v2695_v4, 16  ;;  %v2074_v4 = vsel %vm3209_vm7, %v2733_v61, %v2073_v43  ;;  %v1385_v43 = vsel %vm3209_vm7, %v1383_v10, %v1384_v62  ;;  %v2734_v62 = vrot.slane %v2726_v49, 9 }
  0xbc   : >> { %v2128_v46 = vunpack.c.l.b16 %v2074_v4  ;;  %v2083_v4 = vrot.slane %v3503_v17, 5 }
  0xbd   : >> { %2504 = vmatmul.msk.bf16.gmra.mxu1 %vm456_vm3, %v2791_v35  ;;  %v3461_v56 = vpop.f32.mrf.mxu3  ;;  %v1247_v35 = vpack.c.b16 %v1239_v8, %v1238_v6  ;;  %v1748_v50 = vrot.slane %v1746_v18, 5  ;;  %v1753_v6 = vrot.slane %v1751_v60, 4  ;;  %v2620_v8 = vrot.slane %v2612_v57, 9 }
  0xbe   : >> { %v3457_v2 = vpop.f32.mrf.mxu0  ;;  %v1919_v18 = vunpack.c.l.b16 %v1739_v33 }
  0xbf   : >> { %v1749_v58 = vsel %vm3101_vm4, %v1744_v42, %v1748_v50  ;;  %v1770_v42 = vshll.u32 %v3503_v17, 16  ;;  %v1382_v32 = vsel %vm3209_vm7, %v2620_v8, %v1381_v54  ;;  %v2699_v54 = vld [vmem:[%s3067_s30 + $0x30] sm:$0xf] }
  0xc0   : >> { %v1920_v22 = vunpack.c.l.b16 %v1749_v58  ;;  %v1431_v33 = vunpack.c.l.b16 %v1382_v32  ;;  %v1432_v58 = vunpack.c.l.b16 %v1385_v43  ;;  %v1391_v43 = vrot.slane %v3299_v55, 5 }
  0xc1   : >> { %v1772_v57 = vrot.slane %v1770_v42, 5  ;;  %v2613_v42 = vld [vmem:[%s3067_s30 + $0x24] sm:$0xe] }
  0xc2   : >> { %v3467_v20 = vpop.f32.mrf.mxu1  ;;  %v1935_v60 = vpack.c.b16 %v1920_v22, %v1919_v18  ;;  %v1446_v8 = vpack.c.b16 %v1432_v58, %v1431_v33  ;;  %v2621_v33 = vrot.slane %v2613_v42, 9  ;;  %v2702_v42 = vld [vmem:[%s3067_s30 + $0x3c] sm:$0xf] }
  0xc3   : >> { %2520 = vmatmul.msk.bf16.gmra.mxu2 %vm456_vm3, %v757_v25 }
  0xc6   : >> { %v3474_v19 = vpop.f32.mrf.mxu2 }
  0xc7   : >> { %2578 = vmatmul.msk.bf16.gmra.mxu3 %vm456_vm3, %v2799_v29  ;;  %v1766_v29 = vrot.slane %v1764_v51, 4 }
  0xc8   : >> { %v3481_v44 = vpop.f32.mrf.mxu0 }
  0xc9   : >> { %v1767_v38 = vor.u32 %v1766_v29, %v1762_v26 }
  0xca   : >> { %v3487_v52 = vpop.f32.mrf.mxu3  ;;  %v610_v25 = vpop.f32.mrf.mxu1 }
  0xcb   : >> { %2610 = vmatmul.msk.bf16.gmra.mxu0 %vm456_vm3, %v1247_v35  ;;  %v611_v24 = vadd.f32 %v610_v25, %v3428_v30  ;;  %v2800_v30 = vld [vmem:[%s3067_s30 + $0x18] sm:$0xff]  ;;  %v1757_v35 = vor.u32 %v1756_v9, %v1753_v6  ;;  %v1768_v61 = vrot.slane %v1767_v38, 4  ;;  %v2080_v6 = vrot.slane %v3478_v39, 5 }
  0xcd   : >> { %2627 = vmatmul.msk.bf16.vlgmr.msra.gmra.mxu1 %vm456_vm3, %v1445_v47  ;;  %v2129_v47 = vunpack.c.l.b16 %v2077_v31  ;;  %v1758_v51 = vrot.slane %v1757_v35, 4  ;;  %v1773_v10 = vsel %vm3101_vm4, %v1768_v61, %v1772_v57  ;;  %v2082_v39 = vrot.slane %v2080_v6, 4 }
  0xce   : >> { %v3497_v15 = vpop.f32.mrf.mxu2  ;;  %v1388_v31 = vrot.slane %v3280_v21, 5  ;;  %v1778_v35 = vshll.u32 %v2699_v54, 16  ;;  %v1922_v21 = vunpack.c.l.b16 %v1773_v10  ;;  %v2081_v17 = vsel %vm3209_vm7, %v2734_v62, %v2080_v6 }
  0xcf   : >> { %v2144_v9 = vpack.c.b16 %v2129_v47, %v2128_v46  ;;  %v2084_v55 = vsel %vm3209_vm7, %v2082_v39, %v2083_v4 }
  0xd0   : >> { %v3505_v28 = vpop.f32.mrf.mxu0  ;;  %v1390_v58 = vrot.slane %v1388_v31, 4  ;;  %v1780_v61 = vrot.slane %v1778_v35, 5 }
  0xd2   : >> { %v3512_v50 = vpop.f32.mrf.mxu3  ;;  %v612_v1 = vpop.f32.mrf.mxu1  ;;  %v1392_v10 = vsel %vm3209_vm7, %v1390_v58, %v1391_v43 }
  0xd3   : >> { %2685 = vmatmul.msk.bf16.vlgmr.msra.gmra.mxu2 %vm456_vm3, %v2800_v30  ;;  %v613_v48 = vadd.f32 %v612_v1, %v3457_v2  ;;  %v1763_v30 = vsel %vm3101_vm4, %v1758_v51, %v1762_v26  ;;  %v3527_v2 = vld [vmem:[%s3067_s30 + $0x34] sm:$0xf] }
  0xd4   : >> { %v1784_v1 = vshll.u32 %v3527_v2, 16  ;;  %v1788_v32 = vshrl.u32 %v3527_v2, 16 }
  0xd6   : >> { %v794_v25 = vpop.f32.mrf.mxu2  ;;  %v1786_v57 = vrot.slane %v1784_v1, 5 }
  0xd7   : >> { %v834_v13 = vadd.f32 %v794_v25, %v611_v24  ;;  %2717 = vmatmul.msk.bf16.vlgmr.msra.gmra.mxu3 %vm456_vm3, %v1935_v60  ;;  %v1775_v24 = vshrl.u32 %v2699_v54, 16  ;;  %v1921_v60 = vunpack.c.l.b16 %v1763_v30  ;;  %v2801_v25 = vld [vmem:[%s3067_s30 + $0x24] sm:$0xff]  ;;  %v3548_v54 = vld [vmem:[%s3067_s30 + $0x38] sm:$0x1]  ;;  %v2130_v30 = vunpack.c.l.b16 %v2081_v17  ;;  %v2727_v17 = vld [vmem:[%s3067_s30 + $0x30] sm:$0xe] }
  0xd8   : >> { %v1284_v29 = vpop.f32.mrf.mxu0  ;;  %v1794_v39 = vshll.u32 %v3548_v54, 16 }
  0xd9   : >> { %v1777_v47 = vrot.slane %v1775_v24, 4 }
  0xda   : >> { %v951_v18 = vpop.f32.mrf.mxu3  ;;  %v615_v22 = vpop.f32.mrf.mxu1 }
  0xdb   : >> { %2741 = vmatmul.msk.bf16.vlgmr.msra.gmra.mxu0 %vm456_vm3, %v2144_v9  ;;  %v991_v26 = vadd.f32 %v951_v18, %v834_v13  ;;  %v616_v38 = vadd.f32 %v615_v22, %v3481_v44  ;;  %v1790_v13 = vrot.slane %v1788_v32, 4  ;;  %v1936_v9 = vpack.c.b16 %v1922_v21, %v1921_v60  ;;  %v3559_v60 = vld [vmem:[%s3067_s30 + $0x40] sm:$0xf] }
  0xdc   : >> { %v1781_v62 = vor.u32 %v1780_v61, %v1777_v47  ;;  %v2087_v47 = vrot.slane %v3527_v2, 5  ;;  %v1812_v58 = vshrl.u32 %v3559_v60, 16 }
  0xdd   : >> { %2628 = vmatmul.msk.bf16.gmra.mxu1 %vm456_vm3, %v1446_v8  ;;  %v3542_v51 = vadd.f32 %v1284_v29, %v991_v26  ;;  %v1389_v8 = vsel %vm3209_vm7, %v2621_v33, %v1388_v31  ;;  %v1791_v22 = vor.u32 %v1790_v13, %v1786_v57  ;;  %v1434_v26 = vunpack.c.l.b16 %v1392_v10 }
  0xde   : >> { %v796_v46 = vpop.f32.mrf.mxu2  ;;  %v1433_v35 = vunpack.c.l.b16 %v1389_v8  ;;  %v1782_v32 = vrot.slane %v1781_v62, 4  ;;  %v2090_v8 = vrot.slane %v3548_v54, 5 }
  0xdf   : >> { %v835_v44 = vadd.f32 %v796_v46, %v613_v48  ;;  %v2131_v48 = vunpack.c.l.b16 %v2084_v55  ;;  %v1792_v43 = vrot.slane %v1791_v22, 4  ;;  %v1796_v46 = vrot.slane %v1794_v39, 5 }
  0xe0   : >> { %v1286_v49 = vpop.f32.mrf.mxu0  ;;  %v1447_v33 = vpack.c.b16 %v1434_v26, %v1433_v35  ;;  %v1787_v13 = vsel %vm3101_vm4, %v1782_v32, %v1786_v57 }
  0xe1   : >> { %v2145_v31 = vpack.c.b16 %v2131_v48, %v2130_v30  ;;  %v1797_v30 = vsel %vm3101_vm4, %v1792_v43, %v1796_v46  ;;  %v2614_v48 = vld [vmem:[%s3067_s30 + $0x30] sm:$0xe] }
  0xe2   : >> { %v953_v6 = vpop.f32.mrf.mxu3  ;;  %v617_v29 = vpop.f32.mrf.mxu1  ;;  %v2622_v35 = vrot.slane %v2614_v48, 9  ;;  %v1924_v32 = vunpack.c.l.b16 %v1797_v30 }
  0xe3   : >> { %2686 = vmatmul.msk.bf16.gmra.mxu2 %vm456_vm3, %v2801_v25  ;;  %v992_v24 = vadd.f32 %v953_v6, %v835_v44  ;;  %v618_v18 = vadd.f32 %v617_v29, %v3505_v28  ;;  %v1799_v44 = vshrl.u32 %v2702_v42, 16  ;;  %v1802_v25 = vshll.u32 %v2702_v42, 16  ;;  %v3583_v42 = vld [vmem:[%s3067_s30 + $0x44] sm:$0x1] }
  0xe4   : >> { %v2735_v6 = vrot.slane %v2727_v17, 9  ;;  %v2089_v29 = vrot.slane %v2087_v47, 4  ;;  %v1818_v17 = vshll.u32 %v3583_v42, 16 }
  0xe5   : >> { %v3562_v21 = vadd.f32 %v1286_v49, %v992_v24  ;;  %v1395_v49 = vrot.slane %v3308_v5, 5  ;;  %v1801_v10 = vrot.slane %v1799_v44, 4  ;;  %v1804_v62 = vrot.slane %v1802_v25, 5 }
  0xe6   : >> { %v799_v4 = vpop.f32.mrf.mxu2  ;;  %v1814_v24 = vrot.slane %v1812_v58, 4  ;;  %v2088_v54 = vsel %vm3209_vm7, %v2735_v6, %v2087_v47  ;;  %v2091_v43 = vsel %vm3209_vm7, %v2089_v29, %v2090_v8  ;;  %v1820_v48 = vrot.slane %v1818_v17, 5  ;;  %v2728_v8 = vld [vmem:[%s3067_s30 + $0x3c] sm:$0xe] }
  0xe7   : >> { %v836_v1 = vadd.f32 %v799_v4, %v616_v38  ;;  %2718 = vmatmul.msk.bf16.gmra.mxu3 %vm456_vm3, %v1936_v9  ;;  %v1808_v38 = vshll.u32 %v3559_v60, 16  ;;  %v2802_v4 = vld [vmem:[%s3067_s30 + $0x30] sm:$0xff]  ;;  %v1397_v26 = vrot.slane %v1395_v49, 4  ;;  %v1805_v46 = vor.u32 %v1804_v62, %v1801_v10 }
  0xe8   : >> { %v1289_v28 = vpop.f32.mrf.mxu0  ;;  %v1396_v25 = vsel %vm3209_vm7, %v2622_v35, %v1395_v49  ;;  %v2133_v58 = vunpack.c.l.b16 %v2091_v43  ;;  %v2094_v10 = vrot.slane %v3559_v60, 5  ;;  %v2705_v49 = vld [vmem:[%s3067_s30 + $0x48] sm:$0xf] }
  0xe9   : >> { %v1810_v5 = vrot.slane %v1808_v38, 5  ;;  %v1823_v35 = vshrl.u32 %v2705_v49, 16 }
  0xea   : >> { %v956_v61 = vpop.f32.mrf.mxu3  ;;  %v620_v55 = vpop.f32.mrf.mxu1 }
  0xeb   : >> { %2742 = vmatmul.msk.bf16.gmra.mxu0 %vm456_vm3, %v2145_v31  ;;  %v993_v9 = vadd.f32 %v956_v61, %v836_v1  ;;  %v621_v2 = vadd.f32 %v620_v55, %v3399_v11  ;;  %v1398_v11 = vrot.slane %v3319_v27, 5  ;;  %v1923_v1 = vunpack.c.l.b16 %v1787_v13 }
  0xec   : >> { %v1806_v55 = vrot.slane %v1805_v46, 4  ;;  %v2615_v46 = vld [vmem:[%s3067_s30 + $0x3c] sm:$0xe] }
  0xed   : >> { %2629 = vmatmul.msk.bf16.gmra.mxu1 %vm456_vm3, %v1447_v33  ;;  %v3578_v22 = vadd.f32 %v1289_v28, %v993_v9  ;;  %v1815_v28 = vor.u32 %v1814_v24, %v1810_v5  ;;  %v1399_v47 = vsel %vm3209_vm7, %v1397_v26, %v1398_v11  ;;  %v1937_v38 = vpack.c.b16 %v1924_v32, %v1923_v1  ;;  %v3605_v11 = vld [vmem:[%s3067_s30 + $0x4c] sm:$0xf] }
  0xee   : >> { %v801_v57 = vpop.f32.mrf.mxu2  ;;  %v1435_v9 = vunpack.c.l.b16 %v1396_v25  ;;  %v1436_v30 = vunpack.c.l.b16 %v1399_v47  ;;  %v2096_v1 = vrot.slane %v2094_v10, 4  ;;  %v2097_v32 = vrot.slane %v3583_v42, 5 }
  0xef   : >> { %v837_v39 = vadd.f32 %v801_v57, %v618_v18  ;;  %v2132_v18 = vunpack.c.l.b16 %v2088_v54  ;;  %v1816_v6 = vrot.slane %v1815_v28, 4  ;;  %v1402_v54 = vrot.slane %v3327_v37, 5 }
  0xf0   : >> { %v1291_v31 = vpop.f32.mrf.mxu0  ;;  %v1832_v28 = vshll.u32 %v3605_v11, 16  ;;  %v1836_v17 = vshrl.u32 %v3605_v11, 16  ;;  %v1825_v25 = vrot.slane %v1823_v35, 4 }
  0xf1   : >> { %v2146_v62 = vpack.c.b16 %v2133_v58, %v2132_v18  ;;  %v1404_v58 = vrot.slane %v1402_v54, 4 }
  0xf2   : >> { %v958_v27 = vpop.f32.mrf.mxu3  ;;  %v622_v44 = vpop.f32.mrf.mxu1 }
  0xf3   : >> { %2687 = vmatmul.msk.bf16.gmra.mxu2 %vm456_vm3, %v2802_v4  ;;  %v994_v33 = vadd.f32 %v958_v27, %v837_v39  ;;  %v623_v61 = vadd.f32 %v622_v44, %v3418_v59  ;;  %v1811_v59 = vsel %vm3101_vm4, %v1806_v55, %v1810_v5  ;;  %v1448_v39 = vpack.c.b16 %v1436_v30, %v1435_v9 }
  0xf4   : >> { %v2736_v4 = vrot.slane %v2728_v8, 9  ;;  %v1405_v27 = vrot.slane %v3342_v63, 5  ;;  %v1925_v18 = vunpack.c.l.b16 %v1811_v59  ;;  %v2098_v63 = vsel %vm3209_vm7, %v2096_v1, %v2097_v32 }
  0xf5   : >> { %v3600_v57 = vadd.f32 %v1291_v31, %v994_v33  ;;  %v1826_v31 = vshll.u32 %v2705_v49, 16  ;;  %v2803_v33 = vld [vmem:[%s3067_s30 + $0x3c] sm:$0xff]  ;;  %v1838_v9 = vrot.slane %v1836_v17, 4 }
  0xf6   : >> { %v804_v13 = vpop.f32.mrf.mxu2  ;;  %v2095_v42 = vsel %vm3209_vm7, %v2736_v4, %v2094_v10  ;;  %v2135_v10 = vunpack.c.l.b16 %v2098_v63 }
  0xf7   : >> { %v838_v29 = vadd.f32 %v804_v13, %v621_v2  ;;  %2719 = vmatmul.msk.bf16.gmra.mxu3 %vm456_vm3, %v1937_v38  ;;  %v1821_v2 = vsel %vm3101_vm4, %v1816_v6, %v1820_v48  ;;  %v2623_v38 = vrot.slane %v2615_v46, 9  ;;  %v1828_v55 = vrot.slane %v1826_v31, 5  ;;  %v2707_v6 = vld [vmem:[%s3067_s30 + $0x50] sm:$0x1]  ;;  %v2729_v46 = vld [vmem:[%s3067_s30 + $0x48] sm:$0xe] }
  0xf8   : >> { %v1294_v24 = vpop.f32.mrf.mxu0  ;;  %v1926_v37 = vunpack.c.l.b16 %v1821_v2  ;;  %v1834_v13 = vrot.slane %v1832_v28, 5  ;;  %v1842_v4 = vshll.u32 %v2707_v6, 16 }
  0xfa   : >> { %v961_v60 = vpop.f32.mrf.mxu3  ;;  %v625_v26 = vpop.f32.mrf.mxu1  ;;  %v1938_v48 = vpack.c.b16 %v1926_v37, %v1925_v18  ;;  %v1839_v2 = vor.u32 %v1838_v9, %v1834_v13  ;;  %v2104_v9 = vrot.slane %v2707_v6, 5 }
  0xfb   : >> { %2743 = vmatmul.msk.bf16.gmra.mxu0 %vm456_vm3, %v2146_v62  ;;  %v995_v5 = vadd.f32 %v961_v60, %v838_v29  ;;  %v626_v43 = vadd.f32 %v625_v26, %v3446_v36  ;;  %v2134_v29 = vunpack.c.l.b16 %v2095_v42  ;;  %v1406_v62 = vsel %vm3209_vm7, %v1404_v58, %v1405_v27  ;;  %v2708_v27 = vld [vmem:[%s3067_s30 + $0x54] sm:$0xf] }
  0xfc   : >> { %v1438_v26 = vunpack.c.l.b16 %v1406_v62  ;;  %v1840_v31 = vrot.slane %v1839_v2, 4  ;;  %v1847_v58 = vshrl.u32 %v2708_v27, 16 }
  0xfd   : >> { %2630 = vmatmul.msk.bf16.gmra.mxu1 %vm456_vm3, %v1448_v39  ;;  %v3620_v47 = vadd.f32 %v1294_v24, %v995_v5  ;;  %v1829_v24 = vor.u32 %v1828_v55, %v1825_v25  ;;  %v1844_v5 = vrot.slane %v1842_v4, 5  ;;  %v2737_v25 = vrot.slane %v2729_v46, 9 }
  0xfe   : >> { %v806_v44 = vpop.f32.mrf.mxu2  ;;  %v1850_v55 = vshll.u32 %v2708_v27, 16 }
  0xff   : >> { %v839_v36 = vadd.f32 %v806_v44, %v623_v61  ;;  %v1403_v61 = vsel %vm3209_vm7, %v2623_v38, %v1402_v54  ;;  %v1830_v32 = vrot.slane %v1829_v24, 4  ;;  %v2147_v54 = vpack.c.b16 %v2135_v10, %v2134_v29  ;;  %v3639_v44 = vld [vmem:[%s3067_s30 + $0x58] sm:$0xf]  ;;  %v2804_v10 = vld [vmem:[%s3067_s30 + $0x48] sm:$0xff] }
 0x100   : >> { %v1296_v30 = vpop.f32.mrf.mxu0  ;;  %v1437_v60 = vunpack.c.l.b16 %v1403_v61  ;;  %v1845_v38 = vsel %vm3101_vm4, %v1840_v31, %v1844_v5  ;;  %v1852_v2 = vrot.slane %v1850_v55, 5 }
 0x101   : >> { %v1928_v24 = vunpack.c.l.b16 %v1845_v38 }
 0x102   : >> { %v963_v8 = vpop.f32.mrf.mxu3  ;;  %v627_v49 = vpop.f32.mrf.mxu1  ;;  %v1449_v18 = vpack.c.b16 %v1438_v26, %v1437_v60  ;;  %v3660_v26 = vld [vmem:[%s3067_s30 + $0x5c] sm:$0x1] }
 0x103   : >> { %2688 = vmatmul.msk.bf16.gmra.mxu2 %vm456_vm3, %v2803_v33  ;;  %v996_v59 = vadd.f32 %v963_v8, %v839_v36  ;;  %v628_v39 = vadd.f32 %v627_v49, %v3467_v20  ;;  %v2101_v20 = vrot.slane %v3605_v11, 5  ;;  %v1409_v36 = vrot.slane %v3354_v16, 5  ;;  %v2616_v11 = vld [vmem:[%s3067_s30 + $0x48] sm:$0xe] }
 0x104   : >> { %v2624_v61 = vrot.slane %v2616_v11, 9  ;;  %v2711_v11 = vld [vmem:[%s3067_s30 + $0x60] sm:$0xf] }
 0x105   : >> { %v3634_v28 = vadd.f32 %v1296_v30, %v996_v59  ;;  %v2103_v63 = vrot.slane %v2101_v20, 4  ;;  %v1856_v30 = vshll.u32 %v3639_v44, 16  ;;  %v1411_v62 = vrot.slane %v1409_v36, 4 }
 0x106   : >> { %v809_v35 = vpop.f32.mrf.mxu2  ;;  %v2102_v6 = vsel %vm3209_vm7, %v2737_v25, %v2101_v20  ;;  %v1849_v59 = vrot.slane %v1847_v58, 4  ;;  %v3671_v58 = vld [vmem:[%s3067_s30 + $0x64] sm:$0xf] }
 0x107   : >> { %v840_v1 = vadd.f32 %v809_v35, %v626_v43  ;;  %2720 = vmatmul.msk.bf16.gmra.mxu3 %vm456_vm3, %v1938_v48  ;;  %v1835_v43 = vsel %vm3101_vm4, %v1830_v32, %v1834_v13  ;;  %v1860_v48 = vshrl.u32 %v3639_v44, 16  ;;  %v1412_v13 = vrot.slane %v3369_v53, 5 }
 0x108   : >> { %v1299_v17 = vpop.f32.mrf.mxu0  ;;  %v1927_v49 = vunpack.c.l.b16 %v1835_v43  ;;  %v2105_v53 = vsel %vm3209_vm7, %v2103_v63, %v2104_v9  ;;  %v1858_v35 = vrot.slane %v1856_v30, 5  ;;  %v1853_v20 = vor.u32 %v1852_v2, %v1849_v59 }
 0x109   : >> { %v1862_v60 = vrot.slane %v1860_v48, 4  ;;  %v1413_v31 = vsel %vm3209_vm7, %v1411_v62, %v1412_v13  ;;  %v2108_v48 = vrot.slane %v3639_v44, 5  ;;  %v1416_v62 = vrot.slane %v3382_v3, 5 }
 0x10a   : >> { %v966_v37 = vpop.f32.mrf.mxu3  ;;  %v630_v42 = vpop.f32.mrf.mxu1  ;;  %v1939_v46 = vpack.c.b16 %v1928_v24, %v1927_v49  ;;  %v1854_v55 = vrot.slane %v1853_v20, 4  ;;  %v1884_v24 = vshrl.u32 %v3671_v58, 16 }
 0x10b   : >> { %2744 = vmatmul.msk.bf16.gmra.mxu0 %vm456_vm3, %v2147_v54  ;;  %v997_v33 = vadd.f32 %v966_v37, %v840_v1  ;;  %v1410_v54 = vsel %vm3209_vm7, %v2624_v61, %v1409_v36  ;;  %v631_v27 = vadd.f32 %v630_v42, %v3423_v23  ;;  %v1866_v37 = vshll.u32 %v3660_v26, 16  ;;  %v2730_v42 = vld [vmem:[%s3067_s30 + $0x54] sm:$0xe] }
 0x10c   : >> { %v1439_v25 = vunpack.c.l.b16 %v1410_v54  ;;  %v1859_v44 = vsel %vm3101_vm4, %v1854_v55, %v1858_v35  ;;  %v2738_v2 = vrot.slane %v2730_v42, 9  ;;  %v2110_v3 = vrot.slane %v2108_v48, 4 }
 0x10d   : >> { %2631 = vmatmul.msk.bf16.gmra.mxu1 %vm456_vm3, %v1449_v18  ;;  %v3652_v16 = vadd.f32 %v1299_v17, %v997_v33  ;;  %v2137_v17 = vunpack.c.l.b16 %v2105_v53  ;;  %v1863_v18 = vor.u32 %v1862_v60, %v1858_v35  ;;  %v1440_v33 = vunpack.c.l.b16 %v1413_v31 }
 0x10e   : >> { %v811_v29 = vpop.f32.mrf.mxu2  ;;  %v1868_v23 = vrot.slane %v1866_v37, 5  ;;  %v1929_v20 = vunpack.c.l.b16 %v1859_v44  ;;  %v2731_v44 = vld [vmem:[%s3067_s30 + $0x60] sm:$0xe] }
 0x10f   : >> { %v841_v8 = vadd.f32 %v811_v29, %v628_v39  ;;  %v2136_v39 = vunpack.c.l.b16 %v2102_v6  ;;  %v1864_v30 = vrot.slane %v1863_v18, 4  ;;  %v1450_v13 = vpack.c.b16 %v1440_v33, %v1439_v25  ;;  %v3697_v18 = vld [vmem:[%s3067_s30 + $0x68] sm:$0x1] }
 0x110   : >> { %v1301_v4 = vpop.f32.mrf.mxu0  ;;  %v1871_v29 = vshrl.u32 %v2711_v11, 16  ;;  %v1419_v6 = vrot.slane %v3396_v34, 5 }
 0x111   : >> { %v2148_v36 = vpack.c.b16 %v2137_v17, %v2136_v39  ;;  %v1869_v60 = vsel %vm3101_vm4, %v1864_v30, %v1868_v23 }
 0x112   : >> { %v968_v1 = vpop.f32.mrf.mxu3  ;;  %v632_v32 = vpop.f32.mrf.mxu1  ;;  %v1873_v34 = vrot.slane %v1871_v29, 4 }
 0x113   : >> { %2689 = vmatmul.msk.bf16.gmra.mxu2 %vm456_vm3, %v2804_v10  ;;  %v998_v5 = vadd.f32 %v968_v1, %v841_v8  ;;  %v1874_v8 = vshll.u32 %v2711_v11, 16  ;;  %v1880_v10 = vshll.u32 %v3671_v58, 16  ;;  %v633_v53 = vadd.f32 %v632_v32, %v3450_v45 }
 0x114   : >> { %v2111_v1 = vrot.slane %v3660_v26, 5  ;;  %v1418_v45 = vrot.slane %v1416_v62, 4  ;;  %v1886_v32 = vrot.slane %v1884_v24, 4  ;;  %v2109_v26 = vsel %vm3209_vm7, %v2738_v2, %v2108_v48 }
 0x115   : >> { %v3674_v63 = vadd.f32 %v1301_v4, %v998_v5  ;;  %v2617_v4 = vld [vmem:[%s3067_s30 + $0x54] sm:$0xe]  ;;  %v1876_v54 = vrot.slane %v1874_v8, 5  ;;  %v3691_v31 = vrot.slane %v1880_v10, 5  ;;  %v2138_v42 = vunpack.c.l.b16 %v2109_v26 }
 0x116   : >> { %v814_v43 = vpop.f32.mrf.mxu2  ;;  %v2625_v17 = vrot.slane %v2617_v4, 9  ;;  %v2115_v2 = vrot.slane %v3671_v58, 5  ;;  %v1426_v26 = vrot.slane %v3431_v12, 5 }
 0x117   : >> { %v842_v38 = vadd.f32 %v814_v43, %v631_v27  ;;  %2721 = vmatmul.msk.bf16.gmra.mxu3 %vm456_vm3, %v1939_v46  ;;  %v2805_v46 = vld [vmem:[%s3067_s30 + $0x54] sm:$0xff]  ;;  %v1930_v27 = vunpack.c.l.b16 %v1869_v60  ;;  %v2112_v43 = vsel %vm3209_vm7, %v2110_v3, %v2111_v1  ;;  %v1877_v25 = vor.u32 %v1876_v54, %v1873_v34  ;;  %v2714_v60 = vld [vmem:[%s3067_s30 + $0x6c] sm:$0xf] }
 0x118   : >> { %v1304_v9 = vpop.f32.mrf.mxu0  ;;  %v1417_v11 = vsel %vm3209_vm7, %v2625_v17, %v1416_v62  ;;  %v1887_v55 = vor.u32 %v1886_v32, %v3691_v31  ;;  %v2139_v48 = vunpack.c.l.b16 %v2112_v43  ;;  %v2739_v54 = vrot.slane %v2731_v44, 9  ;;  %v2618_v17 = vld [vmem:[%s3067_s30 + $0x60] sm:$0xe] }
 0x119   : >> { %v1940_v23 = vpack.c.b16 %v1930_v27, %v1929_v20  ;;  %v1441_v8 = vunpack.c.l.b16 %v1417_v11  ;;  %v1878_v62 = vrot.slane %v1877_v25, 4  ;;  %v1898_v32 = vshll.u32 %v2714_v60, 16 }
 0x11a   : >> { %v971_v49 = vpop.f32.mrf.mxu3  ;;  %v635_v61 = vpop.f32.mrf.mxu1  ;;  %v1888_v24 = vrot.slane %v1887_v55, 4  ;;  %v2118_v27 = vrot.slane %v3697_v18, 5 }
 0x11b   : >> { %2745 = vmatmul.msk.bf16.gmra.mxu0 %vm456_vm3, %v2148_v36  ;;  %v999_v59 = vadd.f32 %v971_v49, %v842_v38  ;;  %v1420_v36 = vsel %vm3209_vm7, %v1418_v45, %v1419_v6  ;;  %v1895_v45 = vshrl.u32 %v2714_v60, 16 }
 0x11c   : >> { %v1442_v10 = vunpack.c.l.b16 %v1420_v36  ;;  %v2626_v36 = vrot.slane %v2618_v17, 9 }
 0x11d   : >> { %2632 = vmatmul.msk.bf16.gmra.mxu1 %vm456_vm3, %v1450_v13  ;;  %v3693_v5 = vadd.f32 %v1304_v9, %v999_v59  ;;  %v1890_v9 = vshll.u32 %v3697_v18, 16  ;;  %v636_v13 = vadd.f32 %v635_v61, %v3474_v19  ;;  %v2149_v59 = vpack.c.b16 %v2139_v48, %v2138_v42  ;;  %v3718_v61 = vld [vmem:[%s3067_s30 + $0x70] sm:$0xf]  ;;  %v2716_v48 = vld [vmem:[%s3067_s30 + $0x74] sm:$0x1] }
 0x11e   : >> { %v816_v39 = vpop.f32.mrf.mxu2  ;;  %v1451_v19 = vpack.c.b16 %v1442_v10, %v1441_v8  ;;  %v2116_v18 = vsel %vm3209_vm7, %v2739_v54, %v2115_v2 }
 0x11f   : >> { %v843_v35 = vadd.f32 %v816_v39, %v633_v53  ;;  %v1892_v6 = vrot.slane %v1890_v9, 5  ;;  %v1883_v39 = vsel %vm3101_vm4, %v1878_v62, %v3691_v31  ;;  %v1904_v31 = vshll.u32 %v3718_v61, 16 }
 0x120   : >> { %v1306_v37 = vpop.f32.mrf.mxu0  ;;  %v1931_v11 = vunpack.c.l.b16 %v1883_v39  ;;  %v1900_v9 = vrot.slane %v1898_v32, 5  ;;  %v2122_v32 = vrot.slane %v3718_v61, 5 }
 0x121   : >> { %v1893_v34 = vsel %vm3101_vm4, %v1888_v24, %v1892_v6 }
 0x122   : >> { %v973_v33 = vpop.f32.mrf.mxu3  ;;  %v637_v38 = vpop.f32.mrf.mxu1 }
 0x123   : >> { %2690 = vmatmul.msk.bf16.gmra.mxu2 %vm456_vm3, %v2805_v46  ;;  %v1000_v30 = vadd.f32 %v973_v33, %v843_v35  ;;  %v1423_v35 = vrot.slane %v3411_v7, 5  ;;  %v2117_v46 = vrot.slane %v2115_v2, 4  ;;  %v638_v20 = vadd.f32 %v637_v38, %v3497_v15  ;;  %v2806_v33 = vld [vmem:[%s3067_s30 + $0x60] sm:$0xff] }
 0x124   : >> { %v1932_v15 = vunpack.c.l.b16 %v1893_v34  ;;  %v1897_v38 = vrot.slane %v1895_v45, 4  ;;  %v2732_v45 = vld [vmem:[%s3067_s30 + $0x6c] sm:$0xe] }
 0x125   : >> { %v3714_v4 = vadd.f32 %v1306_v37, %v1000_v30  ;;  %v1908_v37 = vshrl.u32 %v3718_v61, 16  ;;  %v1425_v55 = vrot.slane %v1423_v35, 4  ;;  %v2119_v12 = vsel %vm3209_vm7, %v2117_v46, %v2118_v27 }
 0x126   : >> { %v819_v29 = vpop.f32.mrf.mxu2  ;;  %v1424_v10 = vsel %vm3209_vm7, %v2626_v36, %v1423_v35  ;;  %v1941_v24 = vpack.c.b16 %v1932_v15, %v1931_v11  ;;  %v2141_v6 = vunpack.c.l.b16 %v2119_v12 }
 0x127   : >> { %v844_v49 = vadd.f32 %v819_v29, %v636_v13  ;;  %2722 = vmatmul.msk.bf16.gmra.mxu3 %vm456_vm3, %v1940_v23  ;;  %v1906_v23 = vrot.slane %v1904_v31, 5  ;;  %v1910_v42 = vrot.slane %v1908_v37, 4  ;;  %v2140_v29 = vunpack.c.l.b16 %v2116_v18 }
 0x128   : >> { %v1309_v53 = vpop.f32.mrf.mxu0  ;;  %v2740_v37 = vrot.slane %v2732_v45, 9 }
 0x129   : >> { %v1911_v2 = vor.u32 %v1910_v42, %v1906_v23  ;;  %v2150_v54 = vpack.c.b16 %v2141_v6, %v2140_v29 }
 0x12a   : >> { %v976_v3 = vpop.f32.mrf.mxu3  ;;  %v640_v1 = vpop.f32.mrf.mxu1 }
 0x12b   : >> { %2746 = vmatmul.msk.bf16.gmra.mxu0 %vm456_vm3, %v2149_v59  ;;  %v1001_v58 = vadd.f32 %v976_v3, %v844_v49  ;;  %v1427_v49 = vsel %vm3209_vm7, %v1425_v55, %v1426_v26  ;;  %v1901_v59 = vor.u32 %v1900_v9, %v1897_v38  ;;  %v641_v44 = vadd.f32 %v640_v1, %v3433_v14  ;;  %v2807_v55 = vld [vmem:[%s3067_s30 + $0x6c] sm:$0xff] }
 0x12c   : >> { %v1444_v3 = vunpack.c.l.b16 %v1427_v49  ;;  %v1912_v46 = vrot.slane %v1911_v2, 4  ;;  %v2123_v9 = vsel %vm3209_vm7, %v2740_v37, %v2122_v32 }
 0x12d   : >> { %2633 = vmatmul.msk.bf16.gmra.mxu1 %vm456_vm3, %v1451_v19  ;;  %v3734_v7 = vadd.f32 %v1309_v53, %v1001_v58  ;;  %v1914_v53 = vshll.u32 %v2716_v48, 16  ;;  %v1443_v19 = vunpack.c.l.b16 %v1424_v10  ;;  %v1902_v35 = vrot.slane %v1901_v59, 4 }
 0x12e   : >> { %v821_v43 = vpop.f32.mrf.mxu2  ;;  %v2142_v42 = vunpack.c.l.b16 %v2123_v9 }
 0x12f   : >> { %v845_v25 = vadd.f32 %v821_v43, %v638_v20  ;;  %v1916_v17 = vrot.slane %v1914_v53, 5  ;;  %v1452_v14 = vpack.c.b16 %v1444_v3, %v1443_v19  ;;  %v1907_v31 = vsel %vm3101_vm4, %v1902_v35, %v1906_v23 }
 0x130   : >> { %v1311_v30 = vpop.f32.mrf.mxu0  ;;  %v1933_v15 = vunpack.c.l.b16 %v1907_v31 }
 0x131   : >> { %v1917_v43 = vsel %vm3101_vm4, %v1912_v46, %v1916_v17 }
 0x132   : >> { %v978_v13 = vpop.f32.mrf.mxu3  ;;  %v642_v8 = vpop.f32.mrf.mxu1  ;;  %v1934_v18 = vunpack.c.l.b16 %v1917_v43 }
 0x133   : >> { %2691 = vmatmul.msk.bf16.gmra.mxu2 %vm456_vm3, %v2806_v33  ;;  %v1002_v62 = vadd.f32 %v978_v13, %v845_v25  ;;  %v643_v26 = vadd.f32 %v642_v8, %v3461_v56  ;;  %v2124_v25 = vrot.slane %v2122_v32, 4  ;;  %v2125_v33 = vrot.slane %v2716_v48, 5 }
 0x134   : >> { %v1942_v23 = vpack.c.b16 %v1934_v18, %v1933_v15 }
 0x135   : >> { %v3748_v39 = vadd.f32 %v1311_v30, %v1002_v62  ;;  %v2126_v56 = vsel %vm3209_vm7, %v2124_v25, %v2125_v33 }
 0x136   : >> { %v824_v60 = vpop.f32.mrf.mxu2  ;;  %v2143_v48 = vunpack.c.l.b16 %v2126_v56 }
 0x137   : >> { %v846_v34 = vadd.f32 %v824_v60, %v641_v44  ;;  %2723 = vmatmul.msk.bf16.gmra.mxu3 %vm456_vm3, %v1941_v24 }
 0x138   : >> { %v1314_v58 = vpop.f32.mrf.mxu0  ;;  %v2151_v49 = vpack.c.b16 %v2143_v48, %v2142_v42 }
 0x13a   : >> { %v981_v1 = vpop.f32.mrf.mxu3  ;;  %v645_v20 = vpop.f32.mrf.mxu1 }
 0x13b   : >> { %2747 = vmatmul.msk.bf16.gmra.mxu0 %vm456_vm3, %v2150_v54  ;;  %v1003_v27 = vadd.f32 %v981_v1, %v846_v34  ;;  %v646_v13 = vadd.f32 %v645_v20, %v3487_v52 }
 0x13d   : >> { %2634 = vmatmul.msk.bf16.gmra.mxu1 %vm456_vm3, %v1452_v14  ;;  %v3760_v61 = vadd.f32 %v1314_v58, %v1003_v27 }
 0x13e   : >> { %v826_v11 = vpop.f32.mrf.mxu2 }
 0x13f   : >> { %v847_v36 = vadd.f32 %v826_v11, %v643_v26 }
 0x140   : >> { %v1316_v38 = vpop.f32.mrf.mxu0 }
 0x142   : >> { %v983_v40 = vpop.f32.mrf.mxu3  ;;  %v647_v30 = vpop.f32.mrf.mxu1 }
 0x143   : >> { %2692 = vmatmul.msk.bf16.gmra.mxu2 %vm456_vm3, %v2807_v55  ;;  %v1004_v12 = vadd.f32 %v983_v40, %v847_v36  ;;  %v648_v44 = vadd.f32 %v647_v30, %v3512_v50 }
 0x145   : >> { %v3769_v8 = vadd.f32 %v1316_v38, %v1004_v12 }
 0x146   : >> { %v829_v29 = vpop.f32.mrf.mxu2 }
 0x147   : >> { %v848_v10 = vadd.f32 %v829_v29, %v646_v13  ;;  %2724 = vmatmul.msk.bf16.gmra.mxu3 %vm456_vm3, %v1942_v23 }
 0x148   : >> { %v1319_v62 = vpop.f32.mrf.mxu0 }
 0x14a   : >> { %v986_v41 = vpop.f32.mrf.mxu3  ;;  %v1493_v24 = vpop.f32.mrf.mxu1 }
 0x14b   : >> { %2748 = vmatmul.msk.bf16.gmra.mxu0 %vm456_vm3, %v2151_v49  ;;  %v1005_v6 = vadd.f32 %v986_v41, %v848_v10  ;;  %v1533_v59 = vadd.f32 %v1493_v24, %v3542_v51 }
 0x14d   : >> { %v3775_v53 = vadd.f32 %v1319_v62, %v1005_v6 }
 0x14e   : >> { %v831_v2 = vpop.f32.mrf.mxu2 }
 0x14f   : >> { %v849_v52 = vadd.f32 %v831_v2, %v648_v44 }
 0x150   : >> { %v1321_v60 = vpop.f32.mrf.mxu0 }
 0x152   : >> { %v988_v19 = vpop.f32.mrf.mxu3  ;;  %v1495_v3 = vpop.f32.mrf.mxu1 }
 0x153   : >> { %v1006_v34 = vadd.f32 %v988_v19, %v849_v52  ;;  %v1534_v54 = vadd.f32 %v1495_v3, %v3562_v21 }
 0x155   : >> { %v3778_v58 = vadd.f32 %v1321_v60, %v1006_v34 }
 0x156   : >> { %v1646_v35 = vpop.f32.mrf.mxu2 }
 0x157   : >> { %v1686_v46 = vadd.f32 %v1646_v35, %v1533_v59 }
 0x158   : >> { %v2188_v17 = vpop.f32.mrf.mxu0 }
 0x15a   : >> { %v1983_v45 = vpop.f32.mrf.mxu3  ;;  %v1498_v32 = vpop.f32.mrf.mxu1 }
 0x15b   : >> { %v2023_v51 = vadd.f32 %v1983_v45, %v1686_v46  ;;  %v1535_v50 = vadd.f32 %v1498_v32, %v3578_v22 }
 0x15d   : >> { %v2228_v14 = vadd.f32 %v2188_v17, %v2023_v51 }
 0x15e   : >> { %v1648_v1 = vpop.f32.mrf.mxu2 }
 0x15f   : >> { %v1687_v20 = vadd.f32 %v1648_v1, %v1534_v54  ;;  %v2244_v11 = vmax.f32 %v2228_v14, 0.0 }
 0x160   : >> { %v2190_v27 = vpop.f32.mrf.mxu0 }
 0x162   : >> { %v1985_v31 = vpop.f32.mrf.mxu3  ;;  %v1500_v37 = vpop.f32.mrf.mxu1 }
 0x163   : >> { %v2024_v26 = vadd.f32 %v1985_v31, %v1687_v20  ;;  %v1536_v43 = vadd.f32 %v1500_v37, %v3600_v57 }
 0x165   : >> { %v2229_v21 = vadd.f32 %v2190_v27, %v2024_v26 }
 0x166   : >> { %v1651_v25 = vpop.f32.mrf.mxu2 }
 0x167   : >> { %v1688_v33 = vadd.f32 %v1651_v25, %v1535_v50  ;;  %v2245_v36 = vmax.f32 %v2229_v21, 0.0 }
 0x168   : >> { %v2193_v55 = vpop.f32.mrf.mxu0 }
 0x169   : >> { %v2260_v15 = vadd.f32 %v2245_v36, %v2244_v11 }
 0x16a   : >> { %v1988_v18 = vpop.f32.mrf.mxu3  ;;  %v1503_v38 = vpop.f32.mrf.mxu1 }
 0x16b   : >> { %v2025_v9 = vadd.f32 %v1988_v18, %v1688_v33  ;;  %v1537_v22 = vadd.f32 %v1503_v38, %v3620_v47 }
 0x16d   : >> { %v2230_v56 = vadd.f32 %v2193_v55, %v2025_v9 }
 0x16e   : >> { %v1653_v40 = vpop.f32.mrf.mxu2 }
 0x16f   : >> { %v1689_v30 = vadd.f32 %v1653_v40, %v1536_v43  ;;  %v2246_v12 = vmax.f32 %v2230_v56, 0.0 }
 0x170   : >> { %v2195_v23 = vpop.f32.mrf.mxu0 }
 0x171   : >> { %v2261_v42 = vadd.f32 %v2260_v15, %v2246_v12 }
 0x172   : >> { %v1990_v48 = vpop.f32.mrf.mxu3  ;;  %v1505_v57 = vpop.f32.mrf.mxu1 }
 0x173   : >> { %v2026_v13 = vadd.f32 %v1990_v48, %v1689_v30  ;;  %v1538_v47 = vadd.f32 %v1505_v57, %v3634_v28 }
 0x175   : >> { %v2231_v29 = vadd.f32 %v2195_v23, %v2026_v13 }
 0x176   : >> { %v1656_v10 = vpop.f32.mrf.mxu2 }
 0x177   : >> { %v1690_v49 = vadd.f32 %v1656_v10, %v1537_v22  ;;  %v2247_v62 = vmax.f32 %v2231_v29, 0.0 }
 0x178   : >> { %v2198_v41 = vpop.f32.mrf.mxu0 }
 0x179   : >> { %v2262_v24 = vadd.f32 %v2261_v42, %v2247_v62 }
 0x17a   : >> { %v1993_v6 = vpop.f32.mrf.mxu3  ;;  %v1508_v59 = vpop.f32.mrf.mxu1 }
 0x17b   : >> { %v2027_v44 = vadd.f32 %v1993_v6, %v1690_v49  ;;  %v1539_v45 = vadd.f32 %v1508_v59, %v3652_v16 }
 0x17d   : >> { %v2232_v2 = vadd.f32 %v2198_v41, %v2027_v44 }
 0x17e   : >> { %v1658_v52 = vpop.f32.mrf.mxu2 }
 0x17f   : >> { %v2248_v60 = vmax.f32 %v2232_v2, 0.0  ;;  %v1691_v19 = vadd.f32 %v1658_v52, %v1538_v47 }
 0x180   : >> { %v2200_v3 = vpop.f32.mrf.mxu0 }
 0x181   : >> { %v2263_v34 = vadd.f32 %v2262_v24, %v2248_v60 }
 0x182   : >> { %v1995_v54 = vpop.f32.mrf.mxu3  ;;  %v1510_v35 = vpop.f32.mrf.mxu1 }
 0x183   : >> { %v2028_v46 = vadd.f32 %v1995_v54, %v1691_v19  ;;  %v1540_v37 = vadd.f32 %v1510_v35, %v3674_v63 }
 0x185   : >> { %v2233_v17 = vadd.f32 %v2200_v3, %v2028_v46 }
 0x186   : >> { %v1661_v32 = vpop.f32.mrf.mxu2 }
 0x187   : >> { %v2249_v51 = vmax.f32 %v2233_v17, 0.0  ;;  %v1692_v50 = vadd.f32 %v1661_v32, %v1539_v45 }
 0x188   : >> { %v2203_v14 = vpop.f32.mrf.mxu0 }
 0x189   : >> { %v2264_v1 = vadd.f32 %v2263_v34, %v2249_v51 }
 0x18a   : >> { %v1998_v20 = vpop.f32.mrf.mxu3  ;;  %v1513_v27 = vpop.f32.mrf.mxu1 }
 0x18b   : >> { %v2029_v31 = vadd.f32 %v1998_v20, %v1692_v50  ;;  %v1541_v15 = vadd.f32 %v1513_v27, %v3693_v5 }
 0x18d   : >> { %v2234_v28 = vadd.f32 %v2203_v14, %v2029_v31 }
 0x18e   : >> { %v1663_v26 = vpop.f32.mrf.mxu2 }
 0x18f   : >> { %v2250_v43 = vmax.f32 %v2234_v28, 0.0  ;;  %v1693_v21 = vadd.f32 %v1663_v26, %v1540_v37 }
 0x190   : >> { %v2205_v25 = vpop.f32.mrf.mxu0 }
 0x191   : >> { %v2265_v33 = vadd.f32 %v2264_v1, %v2250_v43 }
 0x192   : >> { %v2000_v11 = vpop.f32.mrf.mxu3  ;;  %v1515_v36 = vpop.f32.mrf.mxu1 }
 0x193   : >> { %v2030_v55 = vadd.f32 %v2000_v11, %v1693_v21  ;;  %v1542_v23 = vadd.f32 %v1515_v36, %v3714_v4 }
 0x195   : >> { %v2235_v16 = vadd.f32 %v2205_v25, %v2030_v55 }
 0x196   : >> { %v1666_v18 = vpop.f32.mrf.mxu2 }
 0x197   : >> { %v2251_v38 = vmax.f32 %v2235_v16, 0.0  ;;  %v1694_v9 = vadd.f32 %v1666_v18, %v1541_v15 }
 0x198   : >> { %v2208_v22 = vpop.f32.mrf.mxu0 }
 0x199   : >> { %v2266_v56 = vadd.f32 %v2265_v33, %v2251_v38 }
 0x19a   : >> { %v2003_v40 = vpop.f32.mrf.mxu3  ;;  %v1518_v30 = vpop.f32.mrf.mxu1 }
 0x19b   : >> { %v2031_v12 = vadd.f32 %v2003_v40, %v1694_v9  ;;  %v1543_v41 = vadd.f32 %v1518_v30, %v3734_v7 }
 0x19d   : >> { %v2236_v63 = vadd.f32 %v2208_v22, %v2031_v12 }
 0x19e   : >> { %v1668_v42 = vpop.f32.mrf.mxu2 }
 0x19f   : >> { %v2252_v48 = vmax.f32 %v2236_v63, 0.0  ;;  %v1695_v57 = vadd.f32 %v1668_v42, %v1542_v23 }
 0x1a0   : >> { %v2210_v13 = vpop.f32.mrf.mxu0 }
 0x1a1   : >> { %v2267_v29 = vadd.f32 %v2266_v56, %v2252_v48 }
 0x1a2   : >> { %v2005_v10 = vpop.f32.mrf.mxu3  ;;  %v1520_v49 = vpop.f32.mrf.mxu1 }
 0x1a3   : >> { %v2032_v62 = vadd.f32 %v2005_v10, %v1695_v57  ;;  %v1544_v19 = vadd.f32 %v1520_v49, %v3748_v39 }
 0x1a5   : >> { %v2237_v5 = vadd.f32 %v2210_v13, %v2032_v62 }
 0x1a6   : >> { %v1671_v24 = vpop.f32.mrf.mxu2 }
 0x1a7   : >> { %v2253_v6 = vmax.f32 %v2237_v5, 0.0  ;;  %v1696_v59 = vadd.f32 %v1671_v24, %v1543_v41 }
 0x1a8   : >> { %v2213_v44 = vpop.f32.mrf.mxu0 }
 0x1a9   : >> { %v2268_v2 = vadd.f32 %v2267_v29, %v2253_v6 }
 0x1aa   : >> { %v2008_v47 = vpop.f32.mrf.mxu3  ;;  %v1523_v60 = vpop.f32.mrf.mxu1 }
 0x1ab   : >> { %v2033_v52 = vadd.f32 %v2008_v47, %v1696_v59  ;;  %v1545_v7 = vadd.f32 %v1523_v60, %v3760_v61  ;;  %v2812_v47 = vld [vmem:[%s3864_s2 + $0x20] sm:$0xff] (%p198_p11)  ;;  %v2810_v60 = vld [vmem:[%s3864_s2 + $0x10] sm:$0xff] (%p198_p11) }
 0x1ad   : >> { %v2238_v4 = vadd.f32 %v2213_v44, %v2033_v52  ;;  %v2811_v52 = vld [vmem:[%s3864_s2 + $0x18] sm:$0xff] (%p198_p11) }
 0x1ae   : >> { %v1673_v3 = vpop.f32.mrf.mxu2 }
 0x1af   : >> { %v2254_v34 = vmax.f32 %v2238_v4, 0.0  ;;  %v1697_v54 = vadd.f32 %v1673_v3, %v1544_v19  ;;  %v2809_v4 = vld [vmem:[%s3864_s2 + $0x8] sm:$0xff] (%p198_p11)  ;;  %v2808_v3 = vld [vmem:[%s3864_s2] sm:$0xff] (%p198_p11) }
 0x1b0   : >> { %v2215_v35 = vpop.f32.mrf.mxu0 }
 0x1b1   : >> { %v2269_v46 = vadd.f32 %v2268_v2, %v2254_v34  ;;  %v2814_v2 = vld [vmem:[%s3864_s2 + $0x30] sm:$0xff] (%p198_p11) }
 0x1b2   : >> { %v2010_v17 = vpop.f32.mrf.mxu3  ;;  %v1525_v50 = vpop.f32.mrf.mxu1 }
 0x1b3   : >> { %v2034_v45 = vadd.f32 %v2010_v17, %v1697_v54  ;;  %v1546_v39 = vadd.f32 %v1525_v50, %v3769_v8  ;;  %v2300_v54 = vld [vmem:[%s3865_s3] sm:$0x1] (%p198_p11) }
 0x1b5   : >> { %v2239_v32 = vadd.f32 %v2215_v35, %v2034_v45 }
 0x1b6   : >> { %v1676_v51 = vpop.f32.mrf.mxu2 }
 0x1b7   : >> { %v2255_v14 = vmax.f32 %v2239_v32, 0.0  ;;  %v1698_v1 = vadd.f32 %v1676_v51, %v1545_v7 }
 0x1b8   : >> { %v2218_v20 = vpop.f32.mrf.mxu0 }
 0x1b9   : >> { %v2270_v27 = vadd.f32 %v2269_v46, %v2255_v14 }
 0x1ba   : >> { %v2013_v31 = vpop.f32.mrf.mxu3  ;;  %v1528_v25 = vpop.f32.mrf.mxu1 }
 0x1bb   : >> { %v2035_v28 = vadd.f32 %v2013_v31, %v1698_v1  ;;  %v1547_v16 = vadd.f32 %v1528_v25, %v3775_v53 }
 0x1bd   : >> { %v2240_v37 = vadd.f32 %v2218_v20, %v2035_v28 }
 0x1be   : >> { %v1678_v26 = vpop.f32.mrf.mxu2 }
 0x1bf   : >> { %v2256_v43 = vmax.f32 %v2240_v37, 0.0  ;;  %v1699_v21 = vadd.f32 %v1678_v26, %v1546_v39 }
 0x1c0   : >> { %v2220_v33 = vpop.f32.mrf.mxu0 }
 0x1c1   : >> { %v2271_v11 = vadd.f32 %v2270_v27, %v2256_v43 }
 0x1c2   : >> { %v2015_v36 = vpop.f32.mrf.mxu3  ;;  %v1530_v22 = vpop.f32.mrf.mxu1 }
 0x1c3   : >> { %v2036_v55 = vadd.f32 %v2015_v36, %v1699_v21  ;;  %v1548_v12 = vadd.f32 %v1530_v22, %v3778_v58  ;;  %v2815_v58 = vld [vmem:[%s3864_s2 + $0x38] sm:$0xff] (%p198_p11) }
 0x1c4   : > { %2349 = vmatpush.bf16.msra.mxu0 (%p198_p11), %v2815_v58 }
 0x1c5   : >> { %v2241_v61 = vadd.f32 %v2220_v33, %v2036_v55 }
 0x1c6   : >> { %v1681_v15 = vpop.f32.mrf.mxu2 }
 0x1c7   : >> { %v2257_v18 = vmax.f32 %v2241_v61, 0.0  ;;  %v1700_v38 = vadd.f32 %v1681_v15, %v1547_v16 }
 0x1c8   : >> { %v2223_v56 = vpop.f32.mrf.mxu0  ;;  %2350 = vmatpush.bf16.msra.mxu0 (%p198_p11), %v2814_v2 }
 0x1c9   : >> { %v2272_v9 = vadd.f32 %v2271_v11, %v2257_v18 }
 0x1ca   : >> { %v2018_v40 = vpop.f32.mrf.mxu3 }
 0x1cb   : >> { %v2037_v30 = vadd.f32 %v2018_v40, %v1700_v38 }
 0x1cd   : >> { %v2242_v8 = vadd.f32 %v2223_v56, %v2037_v30 }
 0x1ce   : >> { %v1683_v63 = vpop.f32.mrf.mxu2 }
 0x1cf   : >> { %v2258_v23 = vmax.f32 %v2242_v8, 0.0  ;;  %v1701_v42 = vadd.f32 %v1683_v63, %v1548_v12 }
 0x1d0   : >> { %v2225_v29 = vpop.f32.mrf.mxu0 }
 0x1d1   : >> { %v2273_v48 = vadd.f32 %v2272_v9, %v2258_v23 }
 0x1d2   : >> { %v2020_v57 = vpop.f32.mrf.mxu3 }
 0x1d3   : >> { %v2038_v13 = vadd.f32 %v2020_v57, %v1701_v42 }
 0x1d5   : >> { %v2243_v10 = vadd.f32 %v2225_v29, %v2038_v13 }
 0x1d7   : >> { %v2259_v53 = vmax.f32 %v2243_v10, 0.0 }
 0x1d9   : >> { %v2274_v49 = vadd.f32 %v2273_v48, %v2259_v53 }
 0x1db   : >> { %v2275_v62 = vrot.slane %v2274_v49, 4 }
 0x1dd   : >> { %v2276_v5 = vadd.f32 %v2275_v62, %v2274_v49 }
 0x1df   : >> { %v2277_v41 = vrot.slane %v2276_v5, 2 }
 0x1e1   : >> { %v2278_v24 = vadd.f32 %v2277_v41, %v2276_v5 }
 0x1e3   : >> { %v2279_v6 = vrot.slane %v2278_v24, 1 }
 0x1e5   : >> { %v2280_v59 = vadd.f32 %v2279_v6, %v2278_v24  ;;  %200 = sbr.rel (!%p198_p11) target bundleno = 24 (0x18), region = 81 }
 0x1e7   : >> { %v2281_v44 = vadd.f32 %v2949_v0, %v2280_v59  }
 0x1e9   : >> { %v3873_v0 = vmov %v2281_v44  ;;  %v2282_v19 = vmul.f32 (%p198_p11), 0.00390625, %v2281_v44 }
 0x1ea   : > { %v2813_v0 = vld [vmem:[%s3864_s2 + $0x28] sm:$0xff] }
 0x1eb   : > { %2351 = vmatpush.bf16.msra.mxu0 %v2813_v0  ;;  %v2283_v34 = vpack.c.bf16 %v2282_v19, %v2282_v19 }
 0x1ef   : > { %2352 = vmatpush.bf16.msra.mxu0 %v2812_v47 }
 0x1f3   : > { %2353 = vmatpush.bf16.msra.mxu0 %v2811_v52 }
 0x1f7   : > { %2354 = vmatpush.bf16.msra.mxu0 %v2810_v60 }
 0x1fb   : > { %2355 = vmatpush.bf16.msra.mxu0 %v2809_v4 }
 0x1ff   : > { %2356 = vmatpush.bf16.msra.mxu0 %v2808_v3 }
 0x202   : > { %2357 = vmatmul.bf16.vlgmr.msra.gmra.mxu0 %v2283_v34 }
 0x27f   : > { %v2358_v35 = vpop.f32.mrf.mxu0 }
 0x280   : > { %v2359_v46 = vadd.f32 %v2358_v35, %v2300_v54 }
 0x282   : > { %2362 = vst [vmem:[%s3038_s7] sm:$0x1] %v2359_v46 }
 0x283   : > { %2902 = shalt.err (!%p2899_p4)
}
 0x284   : > { %2820 = dma.vmem_to_hbm [thread:$0]  (%p3018_p5), %s2375_s9, 16, %s2377_s10, %s2364_s6  }
 0x287   : > { %v2360_v17 = vpop.f32.mrf.mxu0 }
 0x288 PF: > { %p2826_p7 = scmp.ge.s32.totalorder %s2945_s18, 2  ;;  %s2388_s27 = sand.u32 1, %s2933_s15  }
 0x289   : > { %s2389_s7 = scalar_lea.sflag [#allocation3], %s2388_s27 }
 0x28a   : > { %p2823_p8 = pnand %p2826_p7, %p3022_p6 }
 0x28c   : > { %p2824_p9 = pneg %p2823_p8 }
 0x28e   : > { %2928 = dma.done.wait (%p2824_p9), %s2389_s7, 16  }
 0x28f   : > { %2930 = vsyncadd (%p2824_p9), %s2389_s7, 4294967280  ;;  %p14_p10 = scmp.ge.s32.totalorder %s3005_s21, 4   ;;  %s3874_s15 = smov %s2937_s16 }
 0x290   : > { %s3875_s16 = smov %s2941_s17  ;;  %s3876_s17 = smov %s3016_s24 }
 0x291   : > { %s3877_s18 = smov %s3005_s21  ;;  %16 = sbr.rel (!%p14_p10) target bundleno = 3 (0x3), region = 92 }
 0x296   :  { %2394 = vsyncpa [#allocation3], 1 }
 0x297   :  { %2396 = vsyncpa [#allocation3 + $0x1], 1 }

</bundles_post_ra>
